<compile_context>
chip_gen: v7x
topology: tpu7x:2x2x1
jax: 0.10.0
libtpu: 0.0.40
codegen_flags: <defaults>
</compile_context>

<pallas_src>
import jax
import jax.numpy as jnp
from jax.experimental import pallas as pl
from jax.experimental.pallas import tpu as pltpu


# --------------------------------------------------------------------------
# host/trace-side packing helpers
# --------------------------------------------------------------------------
def _cdiv(a, b):
    return (a + b - 1) // b


def _round_up(n, m):
    return _cdiv(n, m) * m


def _pack8(v, lanes, fill=0.0):
    """Flatten `v` and pack it into one dense (8, lanes) f32 tile."""
    v = jnp.reshape(jnp.asarray(v, jnp.float32), (-1,))
    n = v.shape[0]
    total = 8 * lanes
    if n < total:
        v = jnp.pad(v, (0, total - n), constant_values=fill)
    return jnp.reshape(v, (8, lanes))


def _pack_tiles(v, n_tiles, tile_l):
    """Flatten `v` into (n_tiles*8, tile_l), zero padded (pads contribute 0)."""
    v = jnp.reshape(jnp.asarray(v, jnp.float32), (-1,))
    total = n_tiles * 8 * tile_l
    n = v.shape[0]
    if n < total:
        v = jnp.pad(v, (0, total - n), constant_values=0.0)
    return jnp.reshape(v, (n_tiles * 8, tile_l))


# --------------------------------------------------------------------------
# fused loss kernel
#
# Small-slab row layout ((8, Ls) group per quantity, 80 rows total):
#   rows  0- 7: joint X            rows  8-15: joint Y
#   rows 16-23: joint Z (pad 1.0)  rows 24-31: gt_x - cx
#   rows 32-39: gt_y - cy          rows 40-47: (jw*conf)^2 * data_w^2 (pad 0)
#   rows 48-55: prior values       rows 56-63: prior weights (pad 0)
#   rows 64-71: angle values       rows 72-79: angle weights (pad 0)
# --------------------------------------------------------------------------
def _fused_smplify_loss(params4, small_slab, v_packed, pv_packed, *,
                        focal, rho2, temporal_w, tile_l):
    n_rows, lanes = small_slab.shape
    n_tiles = v_packed.shape[0] // 8

    def kernel(params_ref, small_ref, v_ref, pv_ref, out_ref, acc_ref):
        i = pl.program_id(0)

        # ---- temporal (vertex MSE) tile contribution, every grid step ----
        d = v_ref[...] - pv_ref[...]
        tile_term = temporal_w * jnp.sum(d * d)

        @pl.when(i == 0)
        def _init():
            # ---- small terms (joint data term + all priors), computed once
            scale = params_ref[0]
            tx = params_ref[1]
            ty = params_ref[2]
            tz = params_ref[3]

            X = small_ref[0:8, :]
            Y = small_ref[8:16, :]
            Z = small_ref[16:24, :]
            GX = small_ref[24:32, :]     # gt_x - cx (camera center folded)
            GY = small_ref[32:40, :]     # gt_y - cy
            W2 = small_ref[40:48, :]     # (joint_weight*conf)^2 * data_w^2
            PV = small_ref[48:56, :]
            PW = small_ref[56:64, :]
            AV = small_ref[64:72, :]
            AW = small_ref[72:80, :]

            x = scale * X + tx
            y = scale * Y + ty
            z = scale * Z + tz
            # clamp depth away from 0 so padded / degenerate joints stay
            # finite (reference is inf/nan there anyway)
            z = jnp.where(jnp.abs(z) < 1e-8, 1e-8, z)
            f_over_z = focal / z         # exact reciprocal, reused for x & y

            dx = GX - x * f_over_z
            dy = GY - y * f_over_z
            dx2 = dx * dx
            dy2 = dy * dy
            # GMoF robustifier; approx reciprocal OK (denominator >= rho^2)
            gx = rho2 * dx2 * pl.reciprocal(dx2 + rho2, approx=True)
            gy = rho2 * dy2 * pl.reciprocal(dy2 + rho2, approx=True)
            joint_elem = W2 * (gx + gy)

            # L2 priors + angle (bending) prior: exp(pose*sign)^2 = exp(2v)
            prior_elem = PW * (PV * PV) + AW * jnp.exp(2.0 * AV)

            acc_ref[0] = jnp.sum(joint_elem + prior_elem) + tile_term

        @pl.when(i > 0)
        def _accum():
            acc_ref[0] = acc_ref[0] + tile_term

        @pl.when(i == n_tiles - 1)
        def _finalize():
            out_ref[...] = jnp.full((8, 128), acc_ref[0], jnp.float32)

    out = pl.pallas_call(
        kernel,
        out_shape=jax.ShapeDtypeStruct((8, 128), jnp.float32),
        grid=(n_tiles,),
        in_specs=[
            pl.BlockSpec(memory_space=pltpu.MemorySpace.SMEM),   # [scale, t]
            pl.BlockSpec((n_rows, lanes), lambda i: (0, 0)),     # small slab
            pl.BlockSpec((8, tile_l), lambda i: (i, 0)),         # verts tile
            pl.BlockSpec((8, tile_l), lambda i: (i, 0)),         # prev tile
        ],
        out_specs=pl.BlockSpec((8, 128), lambda i: (0, 0)),
        scratch_shapes=[pltpu.SMEM((1,), jnp.float32)],
        compiler_params=pltpu.CompilerParams(
            dimension_semantics=("arbitrary",)),
    )(params4, small_slab, v_packed, pv_packed)
    return out[0, 0]


# --------------------------------------------------------------------------
# SMPLifyLoss (JAX wrapper around the fused Pallas kernel)
# --------------------------------------------------------------------------
class SMPLifyLoss:
    def __init__(self,
                 rho=100.0,
                 data_weight=1.0,
                 body_pose_weight=0.0,
                 shape_weight=0.0,
                 bending_prior_weight=0.0,
                 hand_prior_weight=0.0,
                 expr_prior_weight=0.0,
                 jaw_prior_weight=1.0,
                 coll_loss_weight=0.0,
                 use_joints_conf=True,
                 use_hands=True,
                 use_face=True,
                 interpenetration=True,
                 prev_verts=None,
                 focal_length=500.0,
                 camera_center=(0.0, 0.0)):
        self.rho = float(rho)
        self.data_weight = float(data_weight)
        self.body_pose_weight = float(body_pose_weight)
        self.shape_weight = float(shape_weight)
        self.bending_prior_weight = float(bending_prior_weight)
        self.hand_prior_weight = float(hand_prior_weight)
        self.expr_prior_weight = float(expr_prior_weight)
        # scalar or per-axis (3,) jaw weight supported
        self.jaw_prior_weight = jnp.asarray(jaw_prior_weight, jnp.float32)
        self.coll_loss_weight = float(coll_loss_weight)
        self.use_joints_conf = use_joints_conf
        self.use_hands = use_hands
        self.use_face = use_face
        self.interpenetration = interpenetration
        self.prev_verts = prev_verts
        self.focal_length = float(focal_length)
        self.camera_center = camera_center

        # SMPLify angle prior: knee / elbow indices into the 63-dim body pose
        # with signs, loss = sum(exp(pose[idx]*sign)^2).
        self._angle_idxs = jnp.array([55, 58, 12, 15], dtype=jnp.int32)
        self._angle_signs = jnp.array([1.0, -1.0, -1.0, -1.0], dtype=jnp.float32)

    def reset_loss_weights(self, loss_weight_dict):
        for key, val in loss_weight_dict.items():
            if hasattr(self, key):
                if key == "jaw_prior_weight":
                    setattr(self, key, jnp.asarray(val, jnp.float32))
                else:
                    setattr(self, key, float(val))

    def __call__(self, body_model_output, global_body_translation,
                 body_model_scale, gt_joints, joints_conf, joint_weights,
                 use_vposer=True, pose_embedding=None, prev_verts=None):
        joints = jnp.asarray(body_model_output["joints"], jnp.float32)   # (B,J,3)
        gt = jnp.asarray(gt_joints, jnp.float32)                         # (B,J,2)
        B, J, _ = joints.shape

        # ---- joint data term inputs ----
        conf = (jnp.asarray(joints_conf, jnp.float32) if self.use_joints_conf
                else jnp.ones((B, J), jnp.float32))
        jw = jnp.broadcast_to(
            jnp.asarray(joint_weights, jnp.float32).reshape(-1, J), (B, J))
        # pre-squared weight with data_weight^2 folded in (host side)
        w2 = (jw * conf) ** 2 * (self.data_weight ** 2)

        # ---- L2 prior segments (values + per-element weights) ----
        if use_vposer:
            pose_term = jnp.asarray(pose_embedding, jnp.float32)
        else:
            # TODO(synk): GMM MaxMixturePrior not ported; L2 prior stand-in.
            pose_term = jnp.asarray(body_model_output["body_pose"], jnp.float32)

        segments = [
            (pose_term, self.body_pose_weight ** 2),
            (jnp.asarray(body_model_output["betas"], jnp.float32),
             self.shape_weight ** 2),
        ]
        if self.use_hands:
            segments.append((jnp.asarray(body_model_output["left_hand_pose"],
                                         jnp.float32),
                             self.hand_prior_weight ** 2))
            segments.append((jnp.asarray(body_model_output["right_hand_pose"],
                                         jnp.float32),
                             self.hand_prior_weight ** 2))
        if self.use_face:
            segments.append((jnp.asarray(body_model_output["expression"],
                                         jnp.float32),
                             self.expr_prior_weight ** 2))
            jaw_scaled = (jnp.asarray(body_model_output["jaw_pose"], jnp.float32)
                          * self.jaw_prior_weight)
            segments.append((jaw_scaled, 1.0))

        prior_vals = jnp.concatenate([jnp.reshape(s, (-1,)) for s, _ in segments])
        prior_wts = jnp.concatenate(
            [jnp.full((s.size,), wgt, jnp.float32) for s, wgt in segments])

        # ---- angle (bending) prior values ----
        body_pose = jnp.asarray(body_model_output["full_pose"], jnp.float32)[:, 3:66]
        ang_vals = (body_pose[:, self._angle_idxs] * self._angle_signs).reshape(-1)
        ang_wts = jnp.full((ang_vals.size,), self.bending_prior_weight, jnp.float32)

        # ---- temporal term (prev_verts now a traced argument) ----
        prev = prev_verts if prev_verts is not None else self.prev_verts
        if prev is not None:
            verts0 = jnp.asarray(body_model_output["vertices"], jnp.float32)[0]
            prev = jnp.asarray(prev, jnp.float32)
            n_temporal = int(verts0.size)
            temporal_w = 1.0 / float(n_temporal)
        else:
            verts0 = jnp.zeros((8, 128), jnp.float32)
            prev = jnp.zeros((8, 128), jnp.float32)
            n_temporal = 8 * 128
            temporal_w = 0.0

        # TODO(synk): interpenetration term (BVH search_tree / pen_distance /
        # tri_filtering) has no Pallas equivalent; inactive for
        # coll_loss_weight == 0 (the default).

        # ---- small slab: 10 quantities, each a dense (8, Ls) tile ----
        n_joint = B * J
        Ls = max(128, _round_up(_cdiv(max(n_joint, int(prior_vals.size),
                                          int(ang_vals.size)), 8), 128))
        cx, cy = self.camera_center
        small_slab = jnp.concatenate([
            _pack8(joints[..., 0], Ls),                 # X
            _pack8(joints[..., 1], Ls),                 # Y
            _pack8(joints[..., 2], Ls, fill=1.0),       # Z (pad depth 1.0)
            _pack8(gt[..., 0] - cx, Ls),                # gt x - cx
            _pack8(gt[..., 1] - cy, Ls),                # gt y - cy
            _pack8(w2, Ls),                             # squared joint weight
            _pack8(prior_vals, Ls),                     # prior values
            _pack8(prior_wts, Ls),                      # prior weights
            _pack8(ang_vals, Ls),                       # angle values
            _pack8(ang_wts, Ls),                        # angle weights
        ], axis=0)                                      # (80, Ls)

        # ---- vertex tiles for the temporal term (lane-tiled grid) ----
        tile_l = min(2048, max(128, _round_up(_cdiv(n_temporal, 8), 128)))
        n_tiles = max(1, _cdiv(n_temporal, 8 * tile_l))
        v_packed = _pack_tiles(verts0, n_tiles, tile_l)
        pv_packed = _pack_tiles(prev, n_tiles, tile_l)

        t = jnp.asarray(global_body_translation, jnp.float32)
        params4 = jnp.stack([
            jnp.asarray(body_model_scale, jnp.float32), t[0], t[1], t[2]])

        return _fused_smplify_loss(
            params4, small_slab, v_packed, pv_packed,
            focal=float(self.focal_length),
            rho2=float(self.rho) ** 2,
            temporal_w=float(temporal_w),
            tile_l=tile_l)


# --------------------------------------------------------------------------
def _reference_loss(out, trans, scale, gt, conf, jw, pose_emb, prev_verts, mod):
    """Pure-JAX reference mirroring the original forward (vposer path)."""
    pts = scale * out["joints"] + trans
    proj = (mod.focal_length * pts[..., :2] / pts[..., 2:3]
            + jnp.array(mod.camera_center, jnp.float32))
    d = gt - proj
    rho2 = mod.rho ** 2
    gm = rho2 * d * d / (d * d + rho2)
    wts = (jw * conf)[..., None]
    joint_loss = jnp.sum(wts ** 2 * gm) * mod.data_weight ** 2
    pprior = jnp.sum(pose_emb ** 2) * mod.body_pose_weight ** 2
    shape_loss = jnp.sum(out["betas"] ** 2) * mod.shape_weight ** 2
    bp = out["full_pose"][:, 3:66]
    ang = jnp.sum(jnp.exp(bp[:, mod._angle_idxs] * mod._angle_signs) ** 2) \
        * mod.bending_prior_weight
    lh = jnp.sum(out["left_hand_pose"] ** 2) * mod.hand_prior_weight ** 2
    rh = jnp.sum(out["right_hand_pose"] ** 2) * mod.hand_prior_weight ** 2
    ex = jnp.sum(out["expression"] ** 2) * mod.expr_prior_weight ** 2
    jaw = jnp.sum((out["jaw_pose"] * mod.jaw_prior_weight) ** 2)
    temporal = jnp.mean((out["vertices"][0] - prev_verts) ** 2)
    return (joint_loss + pprior + shape_loss + ang + lh + rh + ex + jaw
            + temporal)


if __name__ == "__main__":
    key = jax.random.PRNGKey(0)
    ks = jax.random.split(key, 12)

    B, J, V = 2, 24, 128

    joints = jax.random.normal(ks[0], (B, J, 3), jnp.float32)
    gt_joints = 50.0 * jax.random.normal(ks[1], (B, J, 2), jnp.float32)
    joints_conf = jax.nn.sigmoid(jax.random.normal(ks[2], (B, J), jnp.float32))
    joint_weights = jnp.ones((B, J), jnp.float32)

    body_model_output = {
        "joints": joints,
        "full_pose": 0.1 * jax.random.normal(ks[3], (B, 72), jnp.float32),
        "body_pose": 0.1 * jax.random.normal(ks[4], (B, 63), jnp.float32),
        "betas": jax.random.normal(ks[5], (B, 10), jnp.float32),
        "left_hand_pose": 0.1 * jax.random.normal(ks[6], (B, 12), jnp.float32),
        "right_hand_pose": 0.1 * jax.random.normal(ks[7], (B, 12), jnp.float32),
        "expression": jax.random.normal(ks[8], (B, 10), jnp.float32),
        "jaw_pose": 0.1 * jax.random.normal(ks[9], (B, 3), jnp.float32),
        "vertices": jax.random.normal(ks[10], (B, V, 3), jnp.float32),
    }
    pose_embedding = jax.random.normal(ks[11], (B, 32), jnp.float32)
    prev_verts = jax.random.normal(jax.random.PRNGKey(1), (V, 3), jnp.float32)

    global_body_translation = jnp.array([0.0, 0.0, 10.0], jnp.float32)
    body_model_scale = 1.0

    loss_mod = SMPLifyLoss(
        rho=100.0,
        data_weight=1.0,
        body_pose_weight=1.0,
        shape_weight=0.5,
        bending_prior_weight=1.0,
        hand_prior_weight=1.0,
        expr_prior_weight=1.0,
        jaw_prior_weight=1.0,
        coll_loss_weight=0.0,
        prev_verts=None,
    )

    @jax.jit
    def compute_loss(bmo, trans, gt, conf, jw, pose_emb, prev):
        return loss_mod(
            bmo,
            global_body_translation=trans,
            body_model_scale=body_model_scale,
            gt_joints=gt,
            joints_conf=conf,
            joint_weights=jw,
            use_vposer=True,
            pose_embedding=pose_emb,
            prev_verts=prev,
        )

    total = compute_loss(body_model_output, global_body_translation,
                         gt_joints, joints_conf, joint_weights,
                         pose_embedding, prev_verts)
    total = jax.block_until_ready(total)
    assert jnp.isfinite(total)

    ref = _reference_loss(body_model_output, global_body_translation,
                          body_model_scale, gt_joints, joints_conf,
                          joint_weights, pose_embedding, prev_verts, loss_mod)
    ref = jax.block_until_ready(ref)
    rel_err = abs(float(total) - float(ref)) / (abs(float(ref)) + 1.0)
    assert rel_err < 1e-2, (float(total), float(ref), rel_err)

    print("KERNEL_OK")
</pallas_src>

<mosaic_0001>
module attributes {stable_mosaic.version = 11 : i64} {
  func.func @kernel(%arg0: i32, %arg1: memref<4xf32, #tpu.memory_space<smem>>, %arg2: memref<80x128xf32, #tpu.memory_space<vmem>>, %arg3: memref<8x128xf32, #tpu.memory_space<vmem>>, %arg4: memref<8x128xf32, #tpu.memory_space<vmem>>, %arg5: memref<8x128xf32, #tpu.memory_space<vmem>>, %arg6: memref<1xf32, #tpu.memory_space<smem>>) attributes {dimension_semantics = [#tpu.dimension_semantics<arbitrary>], iteration_bounds = array<i64: 1>, scalar_prefetch = 0 : i64, scratch_operands = 1 : i64, tpu.core_type = #tpu.core_type<tc>, window_params = [{transform_indices = @transform_0, window_bounds = array<i64: 4>}, {pipeline_mode = #tpu.pipeline_mode<synchronous>, transform_indices = @transform_1, window_bounds = array<i64: 80, 128>}, {transform_indices = @transform_2, window_bounds = array<i64: 8, 128>}, {transform_indices = @transform_3, window_bounds = array<i64: 8, 128>}, {pipeline_mode = #tpu.pipeline_mode<synchronous>, transform_indices = @transform_4, window_bounds = array<i64: 8, 128>}]} {
    %c0 = arith.constant 0 : index
    %c0_0 = arith.constant 0 : index
    %0 = vector.load %arg3[%c0, %c0_0] : memref<8x128xf32, #tpu.memory_space<vmem>>, vector<8x128xf32>
    %c0_1 = arith.constant 0 : index
    %c0_2 = arith.constant 0 : index
    %1 = vector.load %arg4[%c0_1, %c0_2] : memref<8x128xf32, #tpu.memory_space<vmem>>, vector<8x128xf32>
    %2 = arith.subf %0, %1 : vector<8x128xf32>
    %3 = arith.mulf %2, %2 : vector<8x128xf32>
    %4 = vector.shape_cast %3 : vector<8x128xf32> to vector<1x8x128xf32>
    %cst = arith.constant dense<0.000000e+00> : vector<1xf32>
    %5 = vector.multi_reduction <add>, %4, %cst [1, 2] : vector<1x8x128xf32> to vector<1xf32>
    %6 = vector.shape_cast %5 : vector<1xf32> to vector<1x1x1xf32>
    %7 = vector.extract %6[0, 0, 0] : f32 from vector<1x1x1xf32>
    %cst_3 = arith.constant 0.00260416674 : f32
    %8 = arith.mulf %cst_3, %7 : f32
    %c0_i32 = arith.constant 0 : i32
    %9 = arith.cmpi eq, %arg0, %c0_i32 : i32
    %10 = arith.extui %9 : i1 to i32
    %c0_i32_4 = arith.constant 0 : i32
    %11 = arith.cmpi ne, %10, %c0_i32_4 : i32
    scf.if %11 {
      %c0_9 = arith.constant 0 : index
      %18 = memref.load %arg1[%c0_9] : memref<4xf32, #tpu.memory_space<smem>>
      %c1 = arith.constant 1 : index
      %19 = memref.load %arg1[%c1] : memref<4xf32, #tpu.memory_space<smem>>
      %c2 = arith.constant 2 : index
      %20 = memref.load %arg1[%c2] : memref<4xf32, #tpu.memory_space<smem>>
      %c3 = arith.constant 3 : index
      %21 = memref.load %arg1[%c3] : memref<4xf32, #tpu.memory_space<smem>>
      %c0_10 = arith.constant 0 : index
      %c0_11 = arith.constant 0 : index
      %22 = vector.load %arg2[%c0_10, %c0_11] : memref<80x128xf32, #tpu.memory_space<vmem>>, vector<8x128xf32>
      %c8 = arith.constant 8 : index
      %c0_12 = arith.constant 0 : index
      %23 = vector.load %arg2[%c8, %c0_12] : memref<80x128xf32, #tpu.memory_space<vmem>>, vector<8x128xf32>
      %c16 = arith.constant 16 : index
      %c0_13 = arith.constant 0 : index
      %24 = vector.load %arg2[%c16, %c0_13] : memref<80x128xf32, #tpu.memory_space<vmem>>, vector<8x128xf32>
      %c24 = arith.constant 24 : index
      %c0_14 = arith.constant 0 : index
      %25 = vector.load %arg2[%c24, %c0_14] : memref<80x128xf32, #tpu.memory_space<vmem>>, vector<8x128xf32>
      %c32 = arith.constant 32 : index
      %c0_15 = arith.constant 0 : index
      %26 = vector.load %arg2[%c32, %c0_15] : memref<80x128xf32, #tpu.memory_space<vmem>>, vector<8x128xf32>
      %c40 = arith.constant 40 : index
      %c0_16 = arith.constant 0 : index
      %27 = vector.load %arg2[%c40, %c0_16] : memref<80x128xf32, #tpu.memory_space<vmem>>, vector<8x128xf32>
      %c48 = arith.constant 48 : index
      %c0_17 = arith.constant 0 : index
      %28 = vector.load %arg2[%c48, %c0_17] : memref<80x128xf32, #tpu.memory_space<vmem>>, vector<8x128xf32>
      %c56 = arith.constant 56 : index
      %c0_18 = arith.constant 0 : index
      %29 = vector.load %arg2[%c56, %c0_18] : memref<80x128xf32, #tpu.memory_space<vmem>>, vector<8x128xf32>
      %c64 = arith.constant 64 : index
      %c0_19 = arith.constant 0 : index
      %30 = vector.load %arg2[%c64, %c0_19] : memref<80x128xf32, #tpu.memory_space<vmem>>, vector<8x128xf32>
      %c72 = arith.constant 72 : index
      %c0_20 = arith.constant 0 : index
      %31 = vector.load %arg2[%c72, %c0_20] : memref<80x128xf32, #tpu.memory_space<vmem>>, vector<8x128xf32>
      %32 = vector.broadcast %18 : f32 to vector<8x128xf32>
      %33 = arith.mulf %32, %22 : vector<8x128xf32>
      %34 = vector.broadcast %19 : f32 to vector<8x128xf32>
      %35 = arith.addf %33, %34 : vector<8x128xf32>
      %36 = vector.broadcast %18 : f32 to vector<8x128xf32>
      %37 = arith.mulf %36, %23 : vector<8x128xf32>
      %38 = vector.broadcast %20 : f32 to vector<8x128xf32>
      %39 = arith.addf %37, %38 : vector<8x128xf32>
      %40 = vector.broadcast %18 : f32 to vector<8x128xf32>
      %41 = arith.mulf %40, %24 : vector<8x128xf32>
      %42 = vector.broadcast %21 : f32 to vector<8x128xf32>
      %43 = arith.addf %41, %42 : vector<8x128xf32>
      %44 = math.absf %43 : vector<8x128xf32>
      %cst_21 = arith.constant 9.99999993E-9 : f32
      %45 = vector.broadcast %cst_21 : f32 to vector<8x128xf32>
      %46 = arith.cmpf olt, %44, %45 : vector<8x128xf32>
      %cst_22 = arith.constant 9.99999993E-9 : f32
      %47 = vector.broadcast %cst_22 : f32 to vector<8x128xf32>
      %48 = arith.select %46, %47, %43 : vector<8x128xi1>, vector<8x128xf32>
      %cst_23 = arith.constant 5.000000e+02 : f32
      %49 = vector.broadcast %cst_23 : f32 to vector<8x128xf32>
      %50 = arith.divf %49, %48 : vector<8x128xf32>
      %51 = arith.mulf %35, %50 : vector<8x128xf32>
      %52 = arith.subf %25, %51 : vector<8x128xf32>
      %53 = arith.mulf %39, %50 : vector<8x128xf32>
      %54 = arith.subf %26, %53 : vector<8x128xf32>
      %55 = arith.mulf %52, %52 : vector<8x128xf32>
      %56 = arith.mulf %54, %54 : vector<8x128xf32>
      %cst_24 = arith.constant 1.000000e+04 : f32
      %57 = vector.broadcast %cst_24 : f32 to vector<8x128xf32>
      %58 = arith.mulf %57, %55 : vector<8x128xf32>
      %cst_25 = arith.constant 1.000000e+04 : f32
      %59 = vector.broadcast %cst_25 : f32 to vector<8x128xf32>
      %60 = arith.addf %55, %59 : vector<8x128xf32>
      %61 = tpu.reciprocal %60 {approx = true} : vector<8x128xf32> -> vector<8x128xf32>
      %62 = arith.mulf %58, %61 : vector<8x128xf32>
      %cst_26 = arith.constant 1.000000e+04 : f32
      %63 = vector.broadcast %cst_26 : f32 to vector<8x128xf32>
      %64 = arith.mulf %63, %56 : vector<8x128xf32>
      %cst_27 = arith.constant 1.000000e+04 : f32
      %65 = vector.broadcast %cst_27 : f32 to vector<8x128xf32>
      %66 = arith.addf %56, %65 : vector<8x128xf32>
      %67 = tpu.reciprocal %66 {approx = true} : vector<8x128xf32> -> vector<8x128xf32>
      %68 = arith.mulf %64, %67 : vector<8x128xf32>
      %69 = arith.addf %62, %68 : vector<8x128xf32>
      %70 = arith.mulf %27, %69 : vector<8x128xf32>
      %71 = arith.mulf %28, %28 : vector<8x128xf32>
      %72 = arith.mulf %29, %71 : vector<8x128xf32>
      %cst_28 = arith.constant 2.000000e+00 : f32
      %73 = vector.broadcast %cst_28 : f32 to vector<8x128xf32>
      %74 = arith.mulf %73, %30 : vector<8x128xf32>
      %75 = math.exp %74 : vector<8x128xf32>
      %76 = arith.mulf %31, %75 : vector<8x128xf32>
      %77 = arith.addf %72, %76 : vector<8x128xf32>
      %78 = arith.addf %70, %77 : vector<8x128xf32>
      %79 = vector.shape_cast %78 : vector<8x128xf32> to vector<1x8x128xf32>
      %cst_29 = arith.constant dense<0.000000e+00> : vector<1xf32>
      %80 = vector.multi_reduction <add>, %79, %cst_29 [1, 2] : vector<1x8x128xf32> to vector<1xf32>
      %81 = vector.shape_cast %80 : vector<1xf32> to vector<1x1x1xf32>
      %82 = vector.extract %81[0, 0, 0] : f32 from vector<1x1x1xf32>
      %83 = arith.addf %82, %8 : f32
      %c0_30 = arith.constant 0 : index
      %84 = memref.load %arg6[%c0_30] : memref<1xf32, #tpu.memory_space<smem>>
      memref.store %83, %arg6[%c0_30] : memref<1xf32, #tpu.memory_space<smem>>
    } else {
    }
    %c0_i32_5 = arith.constant 0 : i32
    %12 = arith.cmpi sgt, %arg0, %c0_i32_5 : i32
    %13 = arith.extui %12 : i1 to i32
    %c0_i32_6 = arith.constant 0 : i32
    %14 = arith.cmpi ne, %13, %c0_i32_6 : i32
    scf.if %14 {
      %c0_9 = arith.constant 0 : index
      %18 = memref.load %arg6[%c0_9] : memref<1xf32, #tpu.memory_space<smem>>
      %19 = arith.addf %18, %8 : f32
      %c0_10 = arith.constant 0 : index
      %20 = memref.load %arg6[%c0_10] : memref<1xf32, #tpu.memory_space<smem>>
      memref.store %19, %arg6[%c0_10] : memref<1xf32, #tpu.memory_space<smem>>
    } else {
    }
    %c0_i32_7 = arith.constant 0 : i32
    %15 = arith.cmpi eq, %arg0, %c0_i32_7 : i32
    %16 = arith.extui %15 : i1 to i32
    %c0_i32_8 = arith.constant 0 : i32
    %17 = arith.cmpi ne, %16, %c0_i32_8 : i32
    scf.if %17 {
      %c0_9 = arith.constant 0 : index
      %18 = memref.load %arg6[%c0_9] : memref<1xf32, #tpu.memory_space<smem>>
      %19 = vector.broadcast %18 : f32 to vector<8x128xf32>
      %c0_10 = arith.constant 0 : index
      %c0_11 = arith.constant 0 : index
      %20 = vector.load %arg5[%c0_10, %c0_11] : memref<8x128xf32, #tpu.memory_space<vmem>>, vector<8x128xf32>
      tpu.vector_store %arg5[%c0_10, %c0_11], %19 {strides = array<i32>} : memref<8x128xf32, #tpu.memory_space<vmem>>, vector<8x128xf32>,
    } else {
    }
    return
  }
  func.func @transform_0(%arg0: i32) -> i32 {
    %c0_i32 = arith.constant 0 : i32
    %c0_i32_0 = arith.constant 0 : i32
    return %c0_i32 : i32
  }
  func.func @transform_1(%arg0: i32) -> (i32, i32) {
    %c0_i32 = arith.constant 0 : i32
    %c0_i32_0 = arith.constant 0 : i32
    %c0_i32_1 = arith.constant 0 : i32
    return %c0_i32, %c0_i32_0 : i32, i32
  }
  func.func @transform_2(%arg0: i32) -> (i32, i32) {
    %c0_i32 = arith.constant 0 : i32
    %c0_i32_0 = arith.constant 0 : i32
    return %arg0, %c0_i32 : i32, i32
  }
  func.func @transform_3(%arg0: i32) -> (i32, i32) {
    %c0_i32 = arith.constant 0 : i32
    %c0_i32_0 = arith.constant 0 : i32
    return %arg0, %c0_i32 : i32, i32
  }
  func.func @transform_4(%arg0: i32) -> (i32, i32) {
    %c0_i32 = arith.constant 0 : i32
    %c0_i32_0 = arith.constant 0 : i32
    %c0_i32_1 = arith.constant 0 : i32
    return %c0_i32, %c0_i32_0 : i32, i32
  }
}

</mosaic_0001>

<bundles_post_ra>
// kernel: squeeze.7
= control target key start
LH: loop header
LB: loop body
LE: loop exit
PB: predicated region body
PF: predicated region fallthrough
CT: control target
= control target key end

     0   :  { %vm7_vm0 = vcmask 195584   ;;  %vm13_vm1 = vcmask 392384   ;;  %s39_s0 = inlined_call_operand.vmem [shape: f32[2,24,1], index: 0, kind: input, shape index: {}]   ;;  %s40_s1 = inlined_call_operand.vmem [shape: f32[48], index: 1, kind: output, shape index: {}]  }
   0x1   :  { %v4_v0 = vld [vmem:[%s39_s0] sm:$0x3]  ;;  %s22_s0 = smov 24  }
   0x2   :  { %5 = vst [vmem:[#allocation1] sm:$0x3] %v4_v0 }
   0x9   :  { %v10_v1 = vld [vmem:[#allocation1 + $0x1] sm:$0x1]   ;;  %v6_v2 = vld [vmem:[#allocation1] sm:$0x1]  }
   0xa   :  { %11 = vrot.lane.b32.xlu0 %v10_v1, %s22_s0  ;;  %8 = vst.msk [vmem:[#allocation0] sm:$0x1] %vm7_vm0, %v6_v2  }
  0x7c   :  { %v12_v3 = vpop.permute.xlu0 %11  }
  0x7d   :  { %14 = vst.msk [vmem:[#allocation0] sm:$0x1] %vm13_vm1, %v12_v3  }
  0x84   :  { %v18_v4 = vld [vmem:[#allocation0] sm:$0x1] }
  0x85   :  { %20 = vst [vmem:[%s40_s1] sm:$0x1] %v18_v4 }

// kernel: squeeze.10
= control target key start
LH: loop header
LB: loop body
LE: loop exit
PB: predicated region body
PF: predicated region fallthrough
CT: control target
= control target key end

     0   :  { %vm7_vm0 = vcmask 195584   ;;  %vm13_vm1 = vcmask 392384   ;;  %s39_s0 = inlined_call_operand.vmem [shape: f32[2,24], index: 0, kind: input, shape index: {}]   ;;  %s40_s1 = inlined_call_operand.vmem [shape: f32[48], index: 1, kind: output, shape index: {}]  }
   0x1   :  { %v4_v0 = vld [vmem:[%s39_s0] sm:$0x3]  ;;  %s22_s0 = smov 24  }
   0x2   :  { %5 = vst [vmem:[#allocation1] sm:$0x3] %v4_v0 }
   0x9   :  { %v10_v1 = vld [vmem:[#allocation1 + $0x1] sm:$0x1]   ;;  %v6_v2 = vld [vmem:[#allocation1] sm:$0x1]  }
   0xa   :  { %11 = vrot.lane.b32.xlu0 %v10_v1, %s22_s0  ;;  %8 = vst.msk [vmem:[#allocation0] sm:$0x1] %vm7_vm0, %v6_v2  }
  0x7c   :  { %v12_v3 = vpop.permute.xlu0 %11  }
  0x7d   :  { %14 = vst.msk [vmem:[#allocation0] sm:$0x1] %vm13_vm1, %v12_v3  }
  0x84   :  { %v18_v4 = vld [vmem:[#allocation0] sm:$0x1] }
  0x85   :  { %20 = vst [vmem:[%s40_s1] sm:$0x1] %v18_v4 }

// kernel: squeeze.12
= control target key start
LH: loop header
LB: loop body
LE: loop exit
PB: predicated region body
PF: predicated region fallthrough
CT: control target
= control target key end

     0   :  { %vm9_vm0 = vcmask 7168   ;;  %vm13_vm1 = vcmask 15360   ;;  %s1128_s14 = smov 127   ;;  %s1129_s15 = smov 125   ;;  %vm3_vm2 = vcmask 23552   ;;  %vm16_vm3 = vcmask 1048568   ;;  %s1662_s0 = inlined_call_operand.vmem [shape: f32[1,128,3], index: 0, kind: input, shape index: {}]   ;;  %s1663_s1 = inlined_call_operand.vmem [shape: f32[384], index: 1, kind: output, shape index: {}]  }
   0x1   :  { %v872_v0 = vld [vmem:[%s1662_s0 + $0x55] sm:$0x1]   ;;  %v876_v3 = vld [vmem:[%s1662_s0 + $0x7f] sm:$0x1]   ;;  %v874_v4 = vld [vmem:[%s1662_s0 + $0x2a] sm:$0x1]  }
   0x2   :  { %v873_v1 = vld [vmem:[%s1662_s0 + $0x55] sm:$0x1]   ;;  %34 = vrot.lane.b32.xlu1 %v876_v3, %s1129_s15  ;;  %v875_v5 = vld [vmem:[%s1662_s0 + $0x2a] sm:$0x1]   ;;  %v877_v7 = vld [vmem:[%s1662_s0 + $0x54] sm:$0x1]  }
   0x3   :  { %v10_v2 = vsel %vm9_vm0, %v873_v1, %v872_v0  ;;  %v24_v6 = vsel %vm13_vm1, %v875_v5, %v874_v4  ;;  %s1130_s20 = smov 126   ;;  %s1131_s21 = smov 124   ;;  %v878_v8 = vld [vmem:[%s1662_s0 + $0x29] sm:$0x1]   ;;  %v879_v9 = vld [vmem:[%s1662_s0 + $0x7e] sm:$0x1]  }
   0x4   :  { %11 = vrot.lane.b32.xlu0 %v10_v2, %s1128_s14  ;;  %s1132_s26 = smov 123   ;;  %s1133_s27 = smov 122   ;;  %v880_v10 = vld [vmem:[%s1662_s0 + $0x53] sm:$0x1]   ;;  %v881_v11 = vld [vmem:[%s1662_s0 + $0x28] sm:$0x1]  }
   0x5   :  { %s1134_s3 = smov 121   ;;  %s1135_s4 = smov 120   ;;  %v882_v12 = vld [vmem:[%s1662_s0 + $0x7d] sm:$0x1]   ;;  %v883_v13 = vld [vmem:[%s1662_s0 + $0x52] sm:$0x1]  }
   0x6   :  { %41 = vrot.lane.b32.xlu1 %v877_v7, %s1131_s21  ;;  %s1136_s9 = smov 119   ;;  %s1137_s10 = smov 118   ;;  %v884_v14 = vld [vmem:[%s1662_s0 + $0x27] sm:$0x1]   ;;  %v885_v15 = vld [vmem:[%s1662_s0 + $0x7c] sm:$0x1]  }
   0x7   :  { %s1138_s15 = smov 117   ;;  %s1139_s16 = smov 116   ;;  %v886_v16 = vld [vmem:[%s1662_s0 + $0x51] sm:$0x1]   ;;  %v887_v17 = vld [vmem:[%s1662_s0 + $0x26] sm:$0x1]  }
   0x8   :  { %25 = vrot.lane.b32.xlu0 %v24_v6, %s1130_s20  ;;  %s1140_s21 = smov 115   ;;  %s1141_s22 = smov 114   ;;  %v888_v18 = vld [vmem:[%s1662_s0 + $0x7b] sm:$0x1]   ;;  %v889_v19 = vld [vmem:[%s1662_s0 + $0x50] sm:$0x1]  }
   0x9   :  { %s1143_s28 = smov 112   ;;  %v890_v20 = vld [vmem:[%s1662_s0 + $0x25] sm:$0x1]   ;;  %v891_v21 = vld [vmem:[%s1662_s0 + $0x7a] sm:$0x1]   ;;  %s1144_s6 = smov 111  }
   0xa   :  { %54 = vrot.lane.b32.xlu1 %v879_v9, %s1133_s27  ;;  %s1142_s27 = smov 113   ;;  %v2_v22 = vld [vmem:[%s1662_s0] sm:$0x1]   ;;  %s1145_s7 = smov 110   ;;  %v892_v23 = vld [vmem:[%s1662_s0 + $0x4f] sm:$0x1]  }
   0xb   :  { %4 = vst.msk [vmem:[#allocation0] sm:$0x1] %vm3_vm2, %v2_v22   ;;  %v893_v24 = vld [vmem:[%s1662_s0 + $0x24] sm:$0x1]   ;;  %s1146_s12 = smov 109   ;;  %s1147_s13 = smov 108  }
   0xc   :  { %48 = vrot.lane.b32.xlu0 %v878_v8, %s1132_s26  ;;  %v894_v25 = vld [vmem:[%s1662_s0 + $0x79] sm:$0x1]   ;;  %v895_v26 = vld [vmem:[%s1662_s0 + $0x4e] sm:$0x1]   ;;  %s1148_s18 = smov 107   ;;  %s1149_s19 = smov 106  }
   0xd   :  { %v896_v27 = vld [vmem:[%s1662_s0 + $0x23] sm:$0x1]   ;;  %v897_v28 = vld [vmem:[%s1662_s0 + $0x78] sm:$0x1]   ;;  %s1150_s24 = smov 105   ;;  %s1151_s25 = smov 104  }
   0xe   :  { %68 = vrot.lane.b32.xlu1 %v881_v11, %s1135_s4  ;;  %v898_v29 = vld [vmem:[%s1662_s0 + $0x4d] sm:$0x1]   ;;  %v899_v30 = vld [vmem:[%s1662_s0 + $0x22] sm:$0x1]   ;;  %s1152_s30 = smov 103   ;;  %s1153_s2 = smov 102  }
   0xf   :  { %v900_v31 = vld [vmem:[%s1662_s0 + $0x77] sm:$0x1]   ;;  %v901_v32 = vld [vmem:[%s1662_s0 + $0x4c] sm:$0x1]   ;;  %s1155_s8 = smov 100   ;;  %s1157_s14 = smov 98  }
  0x10   :  { %61 = vrot.lane.b32.xlu0 %v880_v10, %s1134_s3  ;;  %v902_v33 = vld [vmem:[%s1662_s0 + $0x21] sm:$0x1]   ;;  %v903_v34 = vld [vmem:[%s1662_s0 + $0x76] sm:$0x1]   ;;  %v904_v35 = vld [vmem:[%s1662_s0 + $0x4b] sm:$0x1]  }
  0x11   :  { %v905_v36 = vld [vmem:[%s1662_s0 + $0x20] sm:$0x1]   ;;  %s1159_s20 = smov 96   ;;  %v906_v37 = vld [vmem:[%s1662_s0 + $0x75] sm:$0x1]   ;;  %s1161_s26 = smov 94  }
  0x12   :  { %81 = vrot.lane.b32.xlu1 %v883_v13, %s1137_s10  ;;  %v907_v38 = vld [vmem:[%s1662_s0 + $0x4a] sm:$0x1]   ;;  %v908_v39 = vld [vmem:[%s1662_s0 + $0x1f] sm:$0x1]   ;;  %v909_v40 = vld [vmem:[%s1662_s0 + $0x74] sm:$0x1]  }
  0x13   :  { %s1163_s3 = smov 92   ;;  %v910_v41 = vld [vmem:[%s1662_s0 + $0x49] sm:$0x1]   ;;  %v911_v42 = vld [vmem:[%s1662_s0 + $0x1e] sm:$0x1]   ;;  %s1173_s4 = smov 82  }
  0x14   :  { %74 = vrot.lane.b32.xlu0 %v882_v12, %s1136_s9  ;;  %s1165_s9 = smov 90   ;;  %v912_v43 = vld [vmem:[%s1662_s0 + $0x73] sm:$0x1]   ;;  %v913_v44 = vld [vmem:[%s1662_s0 + $0x48] sm:$0x1]   ;;  %s1175_s10 = smov 80  }
  0x15   :  { %v914_v45 = vld [vmem:[%s1662_s0 + $0x1d] sm:$0x1]   ;;  %v915_v46 = vld [vmem:[%s1662_s0 + $0x72] sm:$0x1]   ;;  %v916_v47 = vld [vmem:[%s1662_s0 + $0x47] sm:$0x1]  }
  0x16   :  { %94 = vrot.lane.b32.xlu1 %v885_v15, %s1139_s16  ;;  %v917_v48 = vld [vmem:[%s1662_s0 + $0x1c] sm:$0x1]   ;;  %v918_v49 = vld [vmem:[%s1662_s0 + $0x71] sm:$0x1]   ;;  %v919_v50 = vld [vmem:[%s1662_s0 + $0x46] sm:$0x1]  }
  0x17   :  { %v920_v51 = vld [vmem:[%s1662_s0 + $0x1b] sm:$0x1]   ;;  %v921_v52 = vld [vmem:[%s1662_s0 + $0x70] sm:$0x1]   ;;  %v922_v53 = vld [vmem:[%s1662_s0 + $0x45] sm:$0x1]  }
  0x18   :  { %88 = vrot.lane.b32.xlu0 %v884_v14, %s1138_s15  ;;  %s1167_s15 = smov 88   ;;  %v923_v54 = vld [vmem:[%s1662_s0 + $0x1a] sm:$0x1]   ;;  %s1177_s16 = smov 78   ;;  %v924_v55 = vld [vmem:[%s1662_s0 + $0x6f] sm:$0x1]  }
  0x19   :  { %v925_v56 = vld [vmem:[%s1662_s0 + $0x44] sm:$0x1]   ;;  %v926_v57 = vld [vmem:[%s1662_s0 + $0x19] sm:$0x1]   ;;  %v927_v58 = vld [vmem:[%s1662_s0 + $0x6e] sm:$0x1]  }
  0x1a   :  { %108 = vrot.lane.b32.xlu1 %v887_v17, %s1141_s22  ;;  %s1179_s22 = smov 76   ;;  %v928_v59 = vld [vmem:[%s1662_s0 + $0x43] sm:$0x1]   ;;  %v929_v60 = vld [vmem:[%s1662_s0 + $0x18] sm:$0x1]   ;;  %s1183_s5 = smov 72  }
  0x1b   :  { %v930_v61 = vld [vmem:[%s1662_s0 + $0x6d] sm:$0x1]   ;;  %v931_v62 = vld [vmem:[%s1662_s0 + $0x42] sm:$0x1]   ;;  %s1185_s11 = smov 70   ;;  %vm36_vm4 = vcmask 1048552  }
  0x1c   :  { %101 = vrot.lane.b32.xlu0 %v886_v16, %s1140_s21  ;;  %s1169_s21 = smov 86   ;;  %v932_v63 = vld [vmem:[%s1662_s0 + $0x17] sm:$0x1]   ;;  %v933_v0 = vld [vmem:[%s1662_s0 + $0x6c] sm:$0x1]   ;;  %vm30_vm5 = vcmask 1048560  }
  0x1d   :  { %s1187_s17 = smov 68   ;;  %v934_v3 = vld [vmem:[%s1662_s0 + $0x41] sm:$0x1]   ;;  %vm43_vm6 = vcmask 1040352   ;;  %v935_v4 = vld [vmem:[%s1662_s0 + $0x16] sm:$0x1]  }
  0x1e   :  { %121 = vrot.lane.b32.xlu1 %v889_v19, %s1143_s28  ;;  %s1181_s28 = smov 74   ;;  %vm50_vm7 = vcmask 1032152   ;;  %s1189_s23 = smov 66   ;;  %vm56_vm8 = vcmask 1023952   ;;  %v936_v7 = vld [vmem:[%s1662_s0 + $0x6b] sm:$0x1]  }
  0x1f   :  { %v937_v8 = vld [vmem:[%s1662_s0 + $0x40] sm:$0x1]   ;;  %vm63_vm9 = vcmask 1015752   ;;  %s1191_s29 = smov 64   ;;  %vm70_vm10 = vcmask 1007552   ;;  %vm76_vm11 = vcmask 999352  }
  0x20   :  { %114 = vrot.lane.b32.xlu0 %v888_v18, %s1142_s27  ;;  %s1171_s27 = smov 84   ;;  %v938_v11 = vld [vmem:[%s1662_s0 + $0x15] sm:$0x1]   ;;  %v939_v12 = vld [vmem:[%s1662_s0 + $0x6a] sm:$0x1]   ;;  %vm83_vm12 = vcmask 991152  }
  0x21   :  { %v940_v15 = vld [vmem:[%s1662_s0 + $0x3f] sm:$0x1]   ;;  %v941_v16 = vld [vmem:[%s1662_s0 + $0x14] sm:$0x1]   ;;  %vm90_vm13 = vcmask 982952   ;;  %vm96_vm14 = vcmask 974752  }
  0x22   :  { %134 = vrot.lane.b32.xlu1 %v891_v21, %s1145_s7  ;;  %s1154_s7 = smov 101   ;;  %v942_v19 = vld [vmem:[%s1662_s0 + $0x69] sm:$0x1]   ;;  %vm103_vm15 = vcmask 966552   ;;  %vm123_vm2 = vcmask 941952  }
  0x24   :  { %128 = vrot.lane.b32.xlu0 %v890_v20, %s1144_s6  ;;  %s1193_s6 = smov 62   ;;  %v943_v20 = vld [vmem:[%s1662_s0 + $0x3e] sm:$0x1]  }
  0x26   :  { %148 = vrot.lane.b32.xlu1 %v893_v24, %s1147_s13  ;;  %s1156_s13 = smov 99   ;;  %v945_v24 = vld [vmem:[%s1662_s0 + $0x68] sm:$0x1]  }
  0x28   :  { %141 = vrot.lane.b32.xlu0 %v892_v23, %s1146_s12  ;;  %s1195_s12 = smov 60   ;;  %v944_v23 = vld [vmem:[%s1662_s0 + $0x13] sm:$0x1]  }
  0x2a   :  { %161 = vrot.lane.b32.xlu1 %v895_v26, %s1149_s19  ;;  %s1158_s19 = smov 97  }
  0x2c   :  { %154 = vrot.lane.b32.xlu0 %v894_v25, %s1148_s18  ;;  %s1197_s18 = smov 58  }
  0x2e   :  { %174 = vrot.lane.b32.xlu1 %v897_v28, %s1151_s25  ;;  %s1160_s25 = smov 95   ;;  %v947_v28 = vld [vmem:[%s1662_s0 + $0x12] sm:$0x1]  }
  0x30   :  { %168 = vrot.lane.b32.xlu0 %v896_v27, %s1150_s24  ;;  %s1199_s24 = smov 56   ;;  %v946_v27 = vld [vmem:[%s1662_s0 + $0x3d] sm:$0x1]  }
  0x32   :  { %188 = vrot.lane.b32.xlu1 %v899_v30, %s1153_s2  ;;  %s1162_s2 = smov 93  }
  0x34   :  { %181 = vrot.lane.b32.xlu0 %v898_v29, %s1152_s30  ;;  %s1201_s30 = smov 54  }
  0x36   :  { %201 = vrot.lane.b32.xlu1 %v901_v32, %s1155_s8  ;;  %s1164_s8 = smov 91   ;;  %v949_v32 = vld [vmem:[%s1662_s0 + $0x3c] sm:$0x1]  }
  0x38   :  { %194 = vrot.lane.b32.xlu0 %v900_v31, %s1154_s7  ;;  %v948_v31 = vld [vmem:[%s1662_s0 + $0x67] sm:$0x1]   ;;  %s1203_s7 = smov 52  }
  0x3a   :  { %214 = vrot.lane.b32.xlu1 %v903_v34, %s1157_s14  ;;  %s1166_s14 = smov 89  }
  0x3c   :  { %208 = vrot.lane.b32.xlu0 %v902_v33, %s1156_s13  ;;  %s1205_s13 = smov 50  }
  0x3e   :  { %228 = vrot.lane.b32.xlu1 %v905_v36, %s1159_s20  ;;  %s1168_s20 = smov 87   ;;  %v951_v36 = vld [vmem:[%s1662_s0 + $0x66] sm:$0x1]  }
  0x40   :  { %221 = vrot.lane.b32.xlu0 %v904_v35, %s1158_s19  ;;  %v950_v35 = vld [vmem:[%s1662_s0 + $0x11] sm:$0x1]   ;;  %s1207_s19 = smov 48  }
  0x42   :  { %241 = vrot.lane.b32.xlu1 %v907_v38, %s1161_s26  ;;  %s1170_s26 = smov 85  }
  0x44   :  { %234 = vrot.lane.b32.xlu0 %v906_v37, %s1160_s25  ;;  %s1209_s25 = smov 46  }
  0x46   :  { %254 = vrot.lane.b32.xlu1 %v909_v40, %s1163_s3  ;;  %s1172_s3 = smov 83   ;;  %v953_v40 = vld [vmem:[%s1662_s0 + $0x10] sm:$0x1]  }
  0x48   :  { %248 = vrot.lane.b32.xlu0 %v908_v39, %s1162_s2  ;;  %v952_v39 = vld [vmem:[%s1662_s0 + $0x3b] sm:$0x1]   ;;  %s1211_s2 = smov 44  }
  0x4a   :  { %268 = vrot.lane.b32.xlu1 %v911_v42, %s1165_s9  ;;  %s1174_s9 = smov 81  }
  0x4c   :  { %261 = vrot.lane.b32.xlu0 %v910_v41, %s1164_s8  ;;  %s1213_s8 = smov 42  }
  0x4e   :  { %281 = vrot.lane.b32.xlu1 %v913_v44, %s1167_s15  ;;  %s1176_s15 = smov 79   ;;  %v955_v44 = vld [vmem:[%s1662_s0 + $0x3a] sm:$0x1]  }
  0x50   :  { %274 = vrot.lane.b32.xlu0 %v912_v43, %s1166_s14  ;;  %v954_v43 = vld [vmem:[%s1662_s0 + $0x65] sm:$0x1]   ;;  %s1215_s14 = smov 40  }
  0x52   :  { %294 = vrot.lane.b32.xlu1 %v915_v46, %s1169_s21  ;;  %s1178_s21 = smov 77  }
  0x54   :  { %288 = vrot.lane.b32.xlu0 %v914_v45, %s1168_s20  ;;  %s1217_s20 = smov 38  }
  0x56   :  { %308 = vrot.lane.b32.xlu1 %v917_v48, %s1171_s27  ;;  %s1180_s27 = smov 75   ;;  %v957_v48 = vld [vmem:[%s1662_s0 + $0x64] sm:$0x1]  }
  0x58   :  { %301 = vrot.lane.b32.xlu0 %v916_v47, %s1170_s26  ;;  %v956_v47 = vld [vmem:[%s1662_s0 + $0xf] sm:$0x1]   ;;  %s1219_s26 = smov 36  }
  0x5a   :  { %321 = vrot.lane.b32.xlu1 %v919_v50, %s1173_s4  ;;  %s1182_s4 = smov 73  }
  0x5c   :  { %314 = vrot.lane.b32.xlu0 %v918_v49, %s1172_s3  ;;  %s1221_s3 = smov 34  }
  0x5e   :  { %334 = vrot.lane.b32.xlu1 %v921_v52, %s1175_s10  ;;  %s1184_s10 = smov 71   ;;  %v959_v52 = vld [vmem:[%s1662_s0 + $0xe] sm:$0x1]  }
  0x60   :  { %328 = vrot.lane.b32.xlu0 %v920_v51, %s1174_s9  ;;  %v958_v51 = vld [vmem:[%s1662_s0 + $0x39] sm:$0x1]   ;;  %s1223_s9 = smov 32  }
  0x62   :  { %348 = vrot.lane.b32.xlu1 %v923_v54, %s1177_s16  ;;  %s1186_s16 = smov 69  }
  0x64   :  { %341 = vrot.lane.b32.xlu0 %v922_v53, %s1176_s15  ;;  %s1225_s15 = smov 30  }
  0x66   :  { %361 = vrot.lane.b32.xlu1 %v925_v56, %s1179_s22  ;;  %s1188_s22 = smov 67   ;;  %v961_v56 = vld [vmem:[%s1662_s0 + $0x38] sm:$0x1]  }
  0x68   :  { %354 = vrot.lane.b32.xlu0 %v924_v55, %s1178_s21  ;;  %v960_v55 = vld [vmem:[%s1662_s0 + $0x63] sm:$0x1]   ;;  %s1227_s21 = smov 28  }
  0x6a   :  { %374 = vrot.lane.b32.xlu1 %v927_v58, %s1181_s28  ;;  %s1190_s28 = smov 65  }
  0x6c   :  { %368 = vrot.lane.b32.xlu0 %v926_v57, %s1180_s27  ;;  %s1229_s27 = smov 26  }
  0x6e   :  { %388 = vrot.lane.b32.xlu1 %v929_v60, %s1183_s5  ;;  %s1192_s5 = smov 63   ;;  %v963_v60 = vld [vmem:[%s1662_s0 + $0x62] sm:$0x1]  }
  0x70   :  { %381 = vrot.lane.b32.xlu0 %v928_v59, %s1182_s4  ;;  %v962_v59 = vld [vmem:[%s1662_s0 + $0xd] sm:$0x1]   ;;  %s1231_s4 = smov 24  }
  0x72   :  { %401 = vrot.lane.b32.xlu1 %v931_v62, %s1185_s11  ;;  %s1194_s11 = smov 61  }
  0x74   :  { %394 = vrot.lane.b32.xlu0 %v930_v61, %s1184_s10  ;;  %v35_v2 = vpop.permute.xlu1 %34   ;;  %s1233_s10 = smov 22  }
  0x76   :  { %v12_v1 = vpop.permute.xlu0 %11   ;;  %414 = vrot.lane.b32.xlu1 %v933_v0, %s1187_s17  ;;  %s1196_s17 = smov 59   ;;  %v965_v0 = vld [vmem:[%s1662_s0 + $0xc] sm:$0x1]  }
  0x77   :  { %15 = vst.msk [vmem:[#allocation0 + $0x2] sm:$0x1] %vm13_vm1, %v12_v1   ;;  %vm116_vm1 = vcmask 950152  }
  0x78   :  { %18 = vst.msk [vmem:[#allocation0 + $0x1] sm:$0x1] %vm16_vm3, %v12_v1   ;;  %408 = vrot.lane.b32.xlu0 %v932_v63, %s1186_s16  ;;  %v42_v6 = vpop.permute.xlu1 %41   ;;  %vm130_vm3 = vcmask 933752   ;;  %v964_v63 = vld [vmem:[%s1662_s0 + $0x37] sm:$0x1]   ;;  %s1235_s16 = smov 20  }
  0x79   :  { %38 = vst.msk [vmem:[#allocation0 + $0x2] sm:$0x1] %vm36_vm4, %v35_v2   ;;  %vm136_vm4 = vcmask 925552  }
  0x7a   :  { %v26_v5 = vpop.permute.xlu0 %25   ;;  %428 = vrot.lane.b32.xlu1 %v935_v4, %s1189_s23  ;;  %s1198_s23 = smov 57   ;;  %v967_v4 = vld [vmem:[%s1662_s0 + $0x36] sm:$0x1]  }
  0x7b   :  { %29 = vst.msk [vmem:[#allocation0 + $0x1] sm:$0x1] %vm9_vm0, %v26_v5   ;;  %vm110_vm0 = vcmask 958352  }
  0x7c   :  { %31 = vst.msk [vmem:[#allocation0] sm:$0x1] %vm30_vm5, %v26_v5   ;;  %421 = vrot.lane.b32.xlu0 %v934_v3, %s1188_s22  ;;  %v55_v10 = vpop.permute.xlu1 %54   ;;  %vm143_vm5 = vcmask 917352   ;;  %v966_v3 = vld [vmem:[%s1662_s0 + $0x61] sm:$0x1]   ;;  %s1237_s22 = smov 18  }
  0x7d   :  { %45 = vst.msk [vmem:[#allocation0 + $0x1] sm:$0x1] %vm43_vm6, %v42_v6   ;;  %vm150_vm6 = vcmask 909152  }
  0x7e   :  { %v49_v9 = vpop.permute.xlu0 %48   ;;  %58 = vst.msk [vmem:[#allocation0 + $0x2] sm:$0x1] %vm56_vm8, %v55_v10   ;;  %441 = vrot.lane.b32.xlu1 %v937_v8, %s1191_s29  ;;  %s1200_s29 = smov 55   ;;  %vm163_vm8 = vcmask 892752   ;;  %v969_v8 = vld [vmem:[%s1662_s0 + $0x60] sm:$0x1]  }
  0x7f   :  { %51 = vst.msk [vmem:[#allocation0] sm:$0x1] %vm50_vm7, %v49_v9   ;;  %vm156_vm7 = vcmask 900952  }
  0x80   :  { %434 = vrot.lane.b32.xlu0 %v936_v7, %s1190_s28  ;;  %v69_v14 = vpop.permute.xlu1 %68   ;;  %v968_v7 = vld [vmem:[%s1662_s0 + $0xb] sm:$0x1]   ;;  %s1239_s28 = smov 16  }
  0x81   :  { %71 = vst.msk [vmem:[#allocation0] sm:$0x1] %vm70_vm10, %v69_v14   ;;  %vm176_vm10 = vcmask 876352  }
  0x82   :  { %v62_v13 = vpop.permute.xlu0 %61   ;;  %454 = vrot.lane.b32.xlu1 %v939_v12, %s1193_s6  ;;  %s1202_s6 = smov 53   ;;  %v971_v12 = vld [vmem:[%s1662_s0 + $0xa] sm:$0x1]  }
  0x83   :  { %65 = vst.msk [vmem:[#allocation0 + $0x1] sm:$0x1] %vm63_vm9, %v62_v13   ;;  %vm170_vm9 = vcmask 884552  }
  0x84   :  { %448 = vrot.lane.b32.xlu0 %v938_v11, %s1192_s5  ;;  %v82_v18 = vpop.permute.xlu1 %81   ;;  %v970_v11 = vld [vmem:[%s1662_s0 + $0x35] sm:$0x1]   ;;  %s1241_s5 = smov 14  }
  0x85   :  { %85 = vst.msk [vmem:[#allocation0 + $0x1] sm:$0x1] %vm83_vm12, %v82_v18   ;;  %vm190_vm12 = vcmask 859952  }
  0x86   :  { %v75_v17 = vpop.permute.xlu0 %74   ;;  %468 = vrot.lane.b32.xlu1 %v941_v16, %s1195_s12  ;;  %s1204_s12 = smov 51   ;;  %v973_v16 = vld [vmem:[%s1662_s0 + $0x34] sm:$0x1]  }
  0x87   :  { %78 = vst.msk [vmem:[#allocation0 + $0x2] sm:$0x1] %vm76_vm11, %v75_v17   ;;  %vm183_vm11 = vcmask 868152  }
  0x88   :  { %461 = vrot.lane.b32.xlu0 %v940_v15, %s1194_s11  ;;  %v95_v22 = vpop.permute.xlu1 %94   ;;  %v972_v15 = vld [vmem:[%s1662_s0 + $0x5f] sm:$0x1]   ;;  %s1243_s11 = smov 12  }
  0x89   :  { %98 = vst.msk [vmem:[#allocation0 + $0x2] sm:$0x1] %vm96_vm14, %v95_v22   ;;  %vm203_vm14 = vcmask 843552  }
  0x8a   :  { %v89_v21 = vpop.permute.xlu0 %88   ;;  %481 = vrot.lane.b32.xlu1 %v943_v20, %s1197_s18  ;;  %s1206_s18 = smov 49   ;;  %v975_v20 = vld [vmem:[%s1662_s0 + $0x5e] sm:$0x1]  }
  0x8b   :  { %91 = vst.msk [vmem:[#allocation0] sm:$0x1] %vm90_vm13, %v89_v21   ;;  %vm196_vm13 = vcmask 851752  }
  0x8c   :  { %474 = vrot.lane.b32.xlu0 %v942_v19, %s1196_s17  ;;  %v109_v26 = vpop.permute.xlu1 %108   ;;  %v974_v19 = vld [vmem:[%s1662_s0 + $0x9] sm:$0x1]   ;;  %s1245_s17 = smov 10  }
  0x8d   :  { %111 = vst.msk [vmem:[#allocation0] sm:$0x1] %vm110_vm0, %v109_v26   ;;  %vm216_vm0 = vcmask 827152  }
  0x8e   :  { %v102_v25 = vpop.permute.xlu0 %101   ;;  %494 = vrot.lane.b32.xlu1 %v945_v24, %s1199_s24  ;;  %s1208_s24 = smov 47   ;;  %v977_v24 = vld [vmem:[%s1662_s0 + $0x8] sm:$0x1]  }
  0x8f   :  { %105 = vst.msk [vmem:[#allocation0 + $0x1] sm:$0x1] %vm103_vm15, %v102_v25   ;;  %vm210_vm15 = vcmask 835352  }
  0x90   :  { %488 = vrot.lane.b32.xlu0 %v944_v23, %s1198_s23  ;;  %v122_v30 = vpop.permute.xlu1 %121   ;;  %v976_v23 = vld [vmem:[%s1662_s0 + $0x33] sm:$0x1]   ;;  %s1247_s23 = smov 8  }
  0x91   :  { %125 = vst.msk [vmem:[#allocation0 + $0x1] sm:$0x1] %vm123_vm2, %v122_v30   ;;  %vm230_vm2 = vcmask 810752  }
  0x92   :  { %v115_v29 = vpop.permute.xlu0 %114   ;;  %508 = vrot.lane.b32.xlu1 %v947_v28, %s1201_s30  ;;  %s1210_s30 = smov 45   ;;  %v979_v28 = vld [vmem:[%s1662_s0 + $0x32] sm:$0x1]  }
  0x93   :  { %118 = vst.msk [vmem:[#allocation0 + $0x2] sm:$0x1] %vm116_vm1, %v115_v29   ;;  %vm223_vm1 = vcmask 818952  }
  0x94   :  { %501 = vrot.lane.b32.xlu0 %v946_v27, %s1200_s29  ;;  %v135_v34 = vpop.permute.xlu1 %134   ;;  %v978_v27 = vld [vmem:[%s1662_s0 + $0x5d] sm:$0x1]   ;;  %s1249_s29 = smov 6  }
  0x95   :  { %138 = vst.msk [vmem:[#allocation0 + $0x2] sm:$0x1] %vm136_vm4, %v135_v34   ;;  %vm243_vm4 = vcmask 794352  }
  0x96   :  { %v129_v33 = vpop.permute.xlu0 %128   ;;  %521 = vrot.lane.b32.xlu1 %v949_v32, %s1203_s7  ;;  %s1212_s7 = smov 43   ;;  %v981_v32 = vld [vmem:[%s1662_s0 + $0x5c] sm:$0x1]  }
  0x97   :  { %131 = vst.msk [vmem:[#allocation0] sm:$0x1] %vm130_vm3, %v129_v33   ;;  %vm236_vm3 = vcmask 802552  }
  0x98   :  { %514 = vrot.lane.b32.xlu0 %v948_v31, %s1202_s6  ;;  %v149_v38 = vpop.permute.xlu1 %148   ;;  %v980_v31 = vld [vmem:[%s1662_s0 + $0x7] sm:$0x1]   ;;  %s1251_s6 = smov 4  }
  0x99   :  { %151 = vst.msk [vmem:[#allocation0] sm:$0x1] %vm150_vm6, %v149_v38   ;;  %vm256_vm6 = vcmask 777952  }
  0x9a   :  { %v142_v37 = vpop.permute.xlu0 %141   ;;  %534 = vrot.lane.b32.xlu1 %v951_v36, %s1205_s13  ;;  %s1214_s13 = smov 41   ;;  %v983_v36 = vld [vmem:[%s1662_s0 + $0x6] sm:$0x1]  }
  0x9b   :  { %145 = vst.msk [vmem:[#allocation0 + $0x1] sm:$0x1] %vm143_vm5, %v142_v37   ;;  %vm250_vm5 = vcmask 786152  }
  0x9c   :  { %528 = vrot.lane.b32.xlu0 %v950_v35, %s1204_s12  ;;  %v162_v42 = vpop.permute.xlu1 %161   ;;  %v982_v35 = vld [vmem:[%s1662_s0 + $0x31] sm:$0x1]   ;;  %s1253_s12 = smov 2  }
  0x9d   :  { %165 = vst.msk [vmem:[#allocation0 + $0x1] sm:$0x1] %vm163_vm8, %v162_v42   ;;  %vm270_vm8 = vcmask 761552  }
  0x9e   :  { %v155_v41 = vpop.permute.xlu0 %154   ;;  %548 = vrot.lane.b32.xlu1 %v953_v40, %s1207_s19  ;;  %s1216_s19 = smov 39   ;;  %v985_v40 = vld [vmem:[%s1662_s0 + $0x30] sm:$0x1]  }
  0x9f   :  { %158 = vst.msk [vmem:[#allocation0 + $0x2] sm:$0x1] %vm156_vm7, %v155_v41   ;;  %vm263_vm7 = vcmask 769752  }
  0xa0   :  { %541 = vrot.lane.b32.xlu0 %v952_v39, %s1206_s18  ;;  %v175_v46 = vpop.permute.xlu1 %174   ;;  %v984_v39 = vld [vmem:[%s1662_s0 + $0x5b] sm:$0x1]  }
  0xa1   :  { %178 = vst.msk [vmem:[#allocation0 + $0x2] sm:$0x1] %vm176_vm10, %v175_v46   ;;  %vm283_vm10 = vcmask 745152  }
  0xa2   :  { %v169_v45 = vpop.permute.xlu0 %168   ;;  %561 = vrot.lane.b32.xlu1 %v955_v44, %s1209_s25  ;;  %s1218_s25 = smov 37   ;;  %v987_v44 = vld [vmem:[%s1662_s0 + $0x5a] sm:$0x1]  }
  0xa3   :  { %171 = vst.msk [vmem:[#allocation0] sm:$0x1] %vm170_vm9, %v169_v45   ;;  %vm276_vm9 = vcmask 753352  }
  0xa4   :  { %554 = vrot.lane.b32.xlu0 %v954_v43, %s1208_s24  ;;  %v189_v50 = vpop.permute.xlu1 %188   ;;  %v986_v43 = vld [vmem:[%s1662_s0 + $0x5] sm:$0x1]  }
  0xa5   :  { %191 = vst.msk [vmem:[#allocation0] sm:$0x1] %vm190_vm12, %v189_v50   ;;  %vm296_vm12 = vcmask 728752  }
  0xa6   :  { %v182_v49 = vpop.permute.xlu0 %181   ;;  %574 = vrot.lane.b32.xlu1 %v957_v48, %s1211_s2  ;;  %s1220_s2 = smov 35   ;;  %v989_v48 = vld [vmem:[%s1662_s0 + $0x4] sm:$0x1]  }
  0xa7   :  { %185 = vst.msk [vmem:[#allocation0 + $0x1] sm:$0x1] %vm183_vm11, %v182_v49   ;;  %vm290_vm11 = vcmask 736952  }
  0xa8   :  { %568 = vrot.lane.b32.xlu0 %v956_v47, %s1210_s30  ;;  %v202_v54 = vpop.permute.xlu1 %201   ;;  %v988_v47 = vld [vmem:[%s1662_s0 + $0x2f] sm:$0x1]  }
  0xa9   :  { %205 = vst.msk [vmem:[#allocation0 + $0x1] sm:$0x1] %vm203_vm14, %v202_v54   ;;  %vm310_vm14 = vcmask 712352  }
  0xaa   :  { %v195_v53 = vpop.permute.xlu0 %194   ;;  %588 = vrot.lane.b32.xlu1 %v959_v52, %s1213_s8  ;;  %s1222_s8 = smov 33   ;;  %v991_v52 = vld [vmem:[%s1662_s0 + $0x2e] sm:$0x1]  }
  0xab   :  { %198 = vst.msk [vmem:[#allocation0 + $0x2] sm:$0x1] %vm196_vm13, %v195_v53   ;;  %vm303_vm13 = vcmask 720552  }
  0xac   :  { %581 = vrot.lane.b32.xlu0 %v958_v51, %s1212_s7  ;;  %v215_v58 = vpop.permute.xlu1 %214   ;;  %v990_v51 = vld [vmem:[%s1662_s0 + $0x59] sm:$0x1]  }
  0xad   :  { %218 = vst.msk [vmem:[#allocation0 + $0x2] sm:$0x1] %vm216_vm0, %v215_v58   ;;  %vm323_vm0 = vcmask 695952  }
  0xae   :  { %v209_v57 = vpop.permute.xlu0 %208   ;;  %601 = vrot.lane.b32.xlu1 %v961_v56, %s1215_s14  ;;  %s1224_s14 = smov 31   ;;  %v993_v56 = vld [vmem:[%s1662_s0 + $0x58] sm:$0x1]  }
  0xaf   :  { %211 = vst.msk [vmem:[#allocation0] sm:$0x1] %vm210_vm15, %v209_v57   ;;  %vm316_vm15 = vcmask 704152  }
  0xb0   :  { %594 = vrot.lane.b32.xlu0 %v960_v55, %s1214_s13  ;;  %v229_v62 = vpop.permute.xlu1 %228   ;;  %v992_v55 = vld [vmem:[%s1662_s0 + $0x3] sm:$0x1]  }
  0xb1   :  { %231 = vst.msk [vmem:[#allocation0] sm:$0x1] %vm230_vm2, %v229_v62   ;;  %vm336_vm2 = vcmask 679552  }
  0xb2   :  { %v222_v61 = vpop.permute.xlu0 %221   ;;  %614 = vrot.lane.b32.xlu1 %v963_v60, %s1217_s20  ;;  %s1226_s20 = smov 29   ;;  %v995_v60 = vld [vmem:[%s1662_s0 + $0x2] sm:$0x1]  }
  0xb3   :  { %225 = vst.msk [vmem:[#allocation0 + $0x1] sm:$0x1] %vm223_vm1, %v222_v61   ;;  %vm330_vm1 = vcmask 687752  }
  0xb4   :  { %608 = vrot.lane.b32.xlu0 %v962_v59, %s1216_s19  ;;  %v242_v2 = vpop.permute.xlu1 %241   ;;  %v994_v59 = vld [vmem:[%s1662_s0 + $0x2d] sm:$0x1]  }
  0xb5   :  { %245 = vst.msk [vmem:[#allocation0 + $0x1] sm:$0x1] %vm243_vm4, %v242_v2   ;;  %vm350_vm4 = vcmask 663152  }
  0xb6   :  { %v235_v1 = vpop.permute.xlu0 %234   ;;  %628 = vrot.lane.b32.xlu1 %v965_v0, %s1219_s26  ;;  %s1228_s26 = smov 27   ;;  %v997_v0 = vld [vmem:[%s1662_s0 + $0x2c] sm:$0x1]  }
  0xb7   :  { %238 = vst.msk [vmem:[#allocation0 + $0x2] sm:$0x1] %vm236_vm3, %v235_v1   ;;  %vm343_vm3 = vcmask 671352  }
  0xb8   :  { %621 = vrot.lane.b32.xlu0 %v964_v63, %s1218_s25  ;;  %v255_v6 = vpop.permute.xlu1 %254   ;;  %v996_v63 = vld [vmem:[%s1662_s0 + $0x57] sm:$0x1]  }
  0xb9   :  { %258 = vst.msk [vmem:[#allocation0 + $0x2] sm:$0x1] %vm256_vm6, %v255_v6   ;;  %vm363_vm6 = vcmask 646752  }
  0xba   :  { %v249_v5 = vpop.permute.xlu0 %248   ;;  %641 = vrot.lane.b32.xlu1 %v967_v4, %s1221_s3  ;;  %s1230_s3 = smov 25   ;;  %v999_v4 = vld [vmem:[%s1662_s0 + $0x56] sm:$0x1]  }
  0xbb   :  { %251 = vst.msk [vmem:[#allocation0] sm:$0x1] %vm250_vm5, %v249_v5   ;;  %vm356_vm5 = vcmask 654952  }
  0xbc   :  { %634 = vrot.lane.b32.xlu0 %v966_v3, %s1220_s2  ;;  %v269_v10 = vpop.permute.xlu1 %268   ;;  %v998_v3 = vld [vmem:[%s1662_s0 + $0x1] sm:$0x1]  }
  0xbd   :  { %271 = vst.msk [vmem:[#allocation0] sm:$0x1] %vm270_vm8, %v269_v10   ;;  %vm376_vm8 = vcmask 630352  }
  0xbe   :  { %v262_v9 = vpop.permute.xlu0 %261   ;;  %654 = vrot.lane.b32.xlu1 %v969_v8, %s1223_s9  ;;  %s1232_s9 = smov 23  }
  0xbf   :  { %265 = vst.msk [vmem:[#allocation0 + $0x1] sm:$0x1] %vm263_vm7, %v262_v9   ;;  %vm370_vm7 = vcmask 638552  }
  0xc0   :  { %648 = vrot.lane.b32.xlu0 %v968_v7, %s1222_s8  ;;  %v282_v14 = vpop.permute.xlu1 %281   ;;  %v1000_v7 = vld [vmem:[%s1662_s0 + $0x2b] sm:$0x1]   ;;  %s1254_s0 = smov 1  }
  0xc1   :  { %285 = vst.msk [vmem:[#allocation0 + $0x1] sm:$0x1] %vm283_vm10, %v282_v14   ;;  %vm390_vm10 = vcmask 613952  }
  0xc2   :  { %v275_v13 = vpop.permute.xlu0 %274   ;;  %668 = vrot.lane.b32.xlu1 %v971_v12, %s1225_s15  ;;  %s1234_s15 = smov 21  }
  0xc3   :  { %278 = vst.msk [vmem:[#allocation0 + $0x2] sm:$0x1] %vm276_vm9, %v275_v13   ;;  %vm383_vm9 = vcmask 622152  }
  0xc4   :  { %661 = vrot.lane.b32.xlu0 %v970_v11, %s1224_s14  ;;  %v295_v18 = vpop.permute.xlu1 %294  }
  0xc5   :  { %298 = vst.msk [vmem:[#allocation0 + $0x2] sm:$0x1] %vm296_vm12, %v295_v18   ;;  %vm403_vm12 = vcmask 597552  }
  0xc6   :  { %v289_v17 = vpop.permute.xlu0 %288   ;;  %681 = vrot.lane.b32.xlu1 %v973_v16, %s1227_s21  ;;  %s1236_s21 = smov 19  }
  0xc7   :  { %291 = vst.msk [vmem:[#allocation0] sm:$0x1] %vm290_vm11, %v289_v17   ;;  %vm396_vm11 = vcmask 605752  }
  0xc8   :  { %674 = vrot.lane.b32.xlu0 %v972_v15, %s1226_s20  ;;  %v309_v22 = vpop.permute.xlu1 %308  }
  0xc9   :  { %311 = vst.msk [vmem:[#allocation0] sm:$0x1] %vm310_vm14, %v309_v22   ;;  %vm416_vm14 = vcmask 581152  }
  0xca   :  { %v302_v21 = vpop.permute.xlu0 %301   ;;  %694 = vrot.lane.b32.xlu1 %v975_v20, %s1229_s27  ;;  %s1238_s27 = smov 17  }
  0xcb   :  { %305 = vst.msk [vmem:[#allocation0 + $0x1] sm:$0x1] %vm303_vm13, %v302_v21   ;;  %vm410_vm13 = vcmask 589352  }
  0xcc   :  { %688 = vrot.lane.b32.xlu0 %v974_v19, %s1228_s26  ;;  %v322_v26 = vpop.permute.xlu1 %321  }
  0xcd   :  { %325 = vst.msk [vmem:[#allocation0 + $0x1] sm:$0x1] %vm323_vm0, %v322_v26   ;;  %vm430_vm0 = vcmask 564752  }
  0xce   :  { %v315_v25 = vpop.permute.xlu0 %314   ;;  %708 = vrot.lane.b32.xlu1 %v977_v24, %s1231_s4  ;;  %s1240_s4 = smov 15  }
  0xcf   :  { %318 = vst.msk [vmem:[#allocation0 + $0x2] sm:$0x1] %vm316_vm15, %v315_v25   ;;  %vm423_vm15 = vcmask 572952  }
  0xd0   :  { %701 = vrot.lane.b32.xlu0 %v976_v23, %s1230_s3  ;;  %v335_v30 = vpop.permute.xlu1 %334  }
  0xd1   :  { %338 = vst.msk [vmem:[#allocation0 + $0x2] sm:$0x1] %vm336_vm2, %v335_v30   ;;  %vm443_vm2 = vcmask 548352  }
  0xd2   :  { %v329_v29 = vpop.permute.xlu0 %328   ;;  %721 = vrot.lane.b32.xlu1 %v979_v28, %s1233_s10  ;;  %s1242_s10 = smov 13  }
  0xd3   :  { %331 = vst.msk [vmem:[#allocation0] sm:$0x1] %vm330_vm1, %v329_v29   ;;  %vm436_vm1 = vcmask 556552  }
  0xd4   :  { %714 = vrot.lane.b32.xlu0 %v978_v27, %s1232_s9  ;;  %v349_v34 = vpop.permute.xlu1 %348  }
  0xd5   :  { %351 = vst.msk [vmem:[#allocation0] sm:$0x1] %vm350_vm4, %v349_v34   ;;  %vm456_vm4 = vcmask 531952  }
  0xd6   :  { %v342_v33 = vpop.permute.xlu0 %341   ;;  %734 = vrot.lane.b32.xlu1 %v981_v32, %s1235_s16  ;;  %s1244_s16 = smov 11  }
  0xd7   :  { %345 = vst.msk [vmem:[#allocation0 + $0x1] sm:$0x1] %vm343_vm3, %v342_v33   ;;  %vm450_vm3 = vcmask 540152  }
  0xd8   :  { %728 = vrot.lane.b32.xlu0 %v980_v31, %s1234_s15  ;;  %v362_v38 = vpop.permute.xlu1 %361  }
  0xd9   :  { %365 = vst.msk [vmem:[#allocation0 + $0x1] sm:$0x1] %vm363_vm6, %v362_v38   ;;  %vm470_vm6 = vcmask 515552  }
  0xda   :  { %v355_v37 = vpop.permute.xlu0 %354   ;;  %748 = vrot.lane.b32.xlu1 %v983_v36, %s1237_s22  ;;  %s1246_s22 = smov 9  }
  0xdb   :  { %358 = vst.msk [vmem:[#allocation0 + $0x2] sm:$0x1] %vm356_vm5, %v355_v37   ;;  %vm463_vm5 = vcmask 523752  }
  0xdc   :  { %741 = vrot.lane.b32.xlu0 %v982_v35, %s1236_s21  ;;  %v375_v42 = vpop.permute.xlu1 %374  }
  0xdd   :  { %378 = vst.msk [vmem:[#allocation0 + $0x2] sm:$0x1] %vm376_vm8, %v375_v42   ;;  %vm483_vm8 = vcmask 499152  }
  0xde   :  { %v369_v41 = vpop.permute.xlu0 %368   ;;  %761 = vrot.lane.b32.xlu1 %v985_v40, %s1239_s28  ;;  %s1248_s28 = smov 7  }
  0xdf   :  { %371 = vst.msk [vmem:[#allocation0] sm:$0x1] %vm370_vm7, %v369_v41   ;;  %vm476_vm7 = vcmask 507352  }
  0xe0   :  { %754 = vrot.lane.b32.xlu0 %v984_v39, %s1238_s27  ;;  %v389_v46 = vpop.permute.xlu1 %388  }
  0xe1   :  { %391 = vst.msk [vmem:[#allocation0] sm:$0x1] %vm390_vm10, %v389_v46   ;;  %vm496_vm10 = vcmask 482752  }
  0xe2   :  { %v382_v45 = vpop.permute.xlu0 %381   ;;  %774 = vrot.lane.b32.xlu1 %v987_v44, %s1241_s5  ;;  %s1250_s5 = smov 5  }
  0xe3   :  { %385 = vst.msk [vmem:[#allocation0 + $0x1] sm:$0x1] %vm383_vm9, %v382_v45   ;;  %vm490_vm9 = vcmask 490952  }
  0xe4   :  { %768 = vrot.lane.b32.xlu0 %v986_v43, %s1240_s4  ;;  %v402_v50 = vpop.permute.xlu1 %401  }
  0xe5   :  { %405 = vst.msk [vmem:[#allocation0 + $0x1] sm:$0x1] %vm403_vm12, %v402_v50   ;;  %vm510_vm12 = vcmask 466352  }
  0xe6   :  { %v395_v49 = vpop.permute.xlu0 %394   ;;  %788 = vrot.lane.b32.xlu1 %v989_v48, %s1243_s11  ;;  %s1252_s11 = smov 3  }
  0xe7   :  { %398 = vst.msk [vmem:[#allocation0 + $0x2] sm:$0x1] %vm396_vm11, %v395_v49   ;;  %vm503_vm11 = vcmask 474552  }
  0xe8   :  { %781 = vrot.lane.b32.xlu0 %v988_v47, %s1242_s10  ;;  %v415_v54 = vpop.permute.xlu1 %414  }
  0xe9   :  { %418 = vst.msk [vmem:[#allocation0 + $0x2] sm:$0x1] %vm416_vm14, %v415_v54   ;;  %vm523_vm14 = vcmask 449952  }
  0xea   :  { %v409_v53 = vpop.permute.xlu0 %408   ;;  %801 = vrot.lane.b32.xlu1 %v991_v52, %s1245_s17 }
  0xeb   :  { %411 = vst.msk [vmem:[#allocation0] sm:$0x1] %vm410_vm13, %v409_v53   ;;  %vm516_vm13 = vcmask 458152  }
  0xec   :  { %794 = vrot.lane.b32.xlu0 %v990_v51, %s1244_s16  ;;  %v429_v58 = vpop.permute.xlu1 %428  }
  0xed   :  { %431 = vst.msk [vmem:[#allocation0] sm:$0x1] %vm430_vm0, %v429_v58   ;;  %vm536_vm0 = vcmask 433552  }
  0xee   :  { %v422_v57 = vpop.permute.xlu0 %421   ;;  %814 = vrot.lane.b32.xlu1 %v993_v56, %s1247_s23 }
  0xef   :  { %425 = vst.msk [vmem:[#allocation0 + $0x1] sm:$0x1] %vm423_vm15, %v422_v57   ;;  %vm530_vm15 = vcmask 441752  }
  0xf0   :  { %808 = vrot.lane.b32.xlu0 %v992_v55, %s1246_s22  ;;  %v442_v62 = vpop.permute.xlu1 %441  }
  0xf1   :  { %445 = vst.msk [vmem:[#allocation0 + $0x1] sm:$0x1] %vm443_vm2, %v442_v62   ;;  %vm550_vm2 = vcmask 417152  }
  0xf2   :  { %v435_v61 = vpop.permute.xlu0 %434   ;;  %828 = vrot.lane.b32.xlu1 %v995_v60, %s1249_s29 }
  0xf3   :  { %438 = vst.msk [vmem:[#allocation0 + $0x2] sm:$0x1] %vm436_vm1, %v435_v61   ;;  %vm543_vm1 = vcmask 425352  }
  0xf4   :  { %821 = vrot.lane.b32.xlu0 %v994_v59, %s1248_s28  ;;  %v455_v2 = vpop.permute.xlu1 %454  }
  0xf5   :  { %458 = vst.msk [vmem:[#allocation0 + $0x2] sm:$0x1] %vm456_vm4, %v455_v2   ;;  %vm563_vm4 = vcmask 400752  }
  0xf6   :  { %v449_v1 = vpop.permute.xlu0 %448   ;;  %841 = vrot.lane.b32.xlu1 %v997_v0, %s1251_s6 }
  0xf7   :  { %451 = vst.msk [vmem:[#allocation0] sm:$0x1] %vm450_vm3, %v449_v1   ;;  %vm556_vm3 = vcmask 408952  }
  0xf8   :  { %834 = vrot.lane.b32.xlu0 %v996_v63, %s1250_s5  ;;  %v469_v6 = vpop.permute.xlu1 %468  }
  0xf9   :  { %471 = vst.msk [vmem:[#allocation0] sm:$0x1] %vm470_vm6, %v469_v6   ;;  %vm576_vm6 = vcmask 384352  }
  0xfa   :  { %v462_v5 = vpop.permute.xlu0 %461   ;;  %854 = vrot.lane.b32.xlu1 %v999_v4, %s1253_s12 }
  0xfb   :  { %465 = vst.msk [vmem:[#allocation0 + $0x1] sm:$0x1] %vm463_vm5, %v462_v5   ;;  %vm570_vm5 = vcmask 392552  }
  0xfc   :  { %848 = vrot.lane.b32.xlu0 %v998_v3, %s1252_s11  ;;  %v482_v9 = vpop.permute.xlu1 %481  }
  0xfd   :  { %485 = vst.msk [vmem:[#allocation0 + $0x1] sm:$0x1] %vm483_vm8, %v482_v9   ;;  %vm590_vm8 = vcmask 367952  }
  0xfe   :  { %v475_v8 = vpop.permute.xlu0 %474  }
  0xff   :  { %478 = vst.msk [vmem:[#allocation0 + $0x2] sm:$0x1] %vm476_vm7, %v475_v8   ;;  %vm583_vm7 = vcmask 376152  }
 0x100   :  { %861 = vrot.lane.b32.xlu0 %v1000_v7, %s1254_s0  ;;  %v495_v11 = vpop.permute.xlu1 %494  }
 0x101   :  { %498 = vst.msk [vmem:[#allocation0 + $0x2] sm:$0x1] %vm496_vm10, %v495_v11   ;;  %vm603_vm10 = vcmask 351552  }
 0x102   :  { %v489_v10 = vpop.permute.xlu0 %488  }
 0x103   :  { %491 = vst.msk [vmem:[#allocation0] sm:$0x1] %vm490_vm9, %v489_v10   ;;  %vm596_vm9 = vcmask 359752  }
 0x104   :  { %v509_v13 = vpop.permute.xlu1 %508  }
 0x105   :  { %511 = vst.msk [vmem:[#allocation0] sm:$0x1] %vm510_vm12, %v509_v13   ;;  %vm616_vm12 = vcmask 335152  }
 0x106   :  { %v502_v12 = vpop.permute.xlu0 %501  }
 0x107   :  { %505 = vst.msk [vmem:[#allocation0 + $0x1] sm:$0x1] %vm503_vm11, %v502_v12   ;;  %vm610_vm11 = vcmask 343352  }
 0x108   :  { %v522_v15 = vpop.permute.xlu1 %521  }
 0x109   :  { %525 = vst.msk [vmem:[#allocation0 + $0x1] sm:$0x1] %vm523_vm14, %v522_v15   ;;  %vm630_vm14 = vcmask 318752  }
 0x10a   :  { %v515_v14 = vpop.permute.xlu0 %514  }
 0x10b   :  { %518 = vst.msk [vmem:[#allocation0 + $0x2] sm:$0x1] %vm516_vm13, %v515_v14   ;;  %vm623_vm13 = vcmask 326952  }
 0x10c   :  { %v535_v17 = vpop.permute.xlu1 %534  }
 0x10d   :  { %538 = vst.msk [vmem:[#allocation0 + $0x2] sm:$0x1] %vm536_vm0, %v535_v17   ;;  %vm643_vm0 = vcmask 302352  }
 0x10e   :  { %v529_v16 = vpop.permute.xlu0 %528  }
 0x10f   :  { %531 = vst.msk [vmem:[#allocation0] sm:$0x1] %vm530_vm15, %v529_v16   ;;  %vm636_vm15 = vcmask 310552  }
 0x110   :  { %v549_v19 = vpop.permute.xlu1 %548  }
 0x111   :  { %551 = vst.msk [vmem:[#allocation0] sm:$0x1] %vm550_vm2, %v549_v19   ;;  %vm656_vm2 = vcmask 285952  }
 0x112   :  { %v542_v18 = vpop.permute.xlu0 %541  }
 0x113   :  { %545 = vst.msk [vmem:[#allocation0 + $0x1] sm:$0x1] %vm543_vm1, %v542_v18   ;;  %vm650_vm1 = vcmask 294152  }
 0x114   :  { %v562_v21 = vpop.permute.xlu1 %561  }
 0x115   :  { %565 = vst.msk [vmem:[#allocation0 + $0x1] sm:$0x1] %vm563_vm4, %v562_v21   ;;  %vm670_vm4 = vcmask 269552  }
 0x116   :  { %v555_v20 = vpop.permute.xlu0 %554  }
 0x117   :  { %558 = vst.msk [vmem:[#allocation0 + $0x2] sm:$0x1] %vm556_vm3, %v555_v20   ;;  %vm663_vm3 = vcmask 277752  }
 0x118   :  { %v575_v23 = vpop.permute.xlu1 %574  }
 0x119   :  { %578 = vst.msk [vmem:[#allocation0 + $0x2] sm:$0x1] %vm576_vm6, %v575_v23   ;;  %vm683_vm6 = vcmask 253152  }
 0x11a   :  { %v569_v22 = vpop.permute.xlu0 %568  }
 0x11b   :  { %571 = vst.msk [vmem:[#allocation0] sm:$0x1] %vm570_vm5, %v569_v22   ;;  %vm676_vm5 = vcmask 261352  }
 0x11c   :  { %v589_v25 = vpop.permute.xlu1 %588  }
 0x11d   :  { %591 = vst.msk [vmem:[#allocation0] sm:$0x1] %vm590_vm8, %v589_v25   ;;  %vm696_vm8 = vcmask 236752  }
 0x11e   :  { %v582_v24 = vpop.permute.xlu0 %581  }
 0x11f   :  { %585 = vst.msk [vmem:[#allocation0 + $0x1] sm:$0x1] %vm583_vm7, %v582_v24   ;;  %vm690_vm7 = vcmask 244952  }
 0x120   :  { %v602_v27 = vpop.permute.xlu1 %601  }
 0x121   :  { %605 = vst.msk [vmem:[#allocation0 + $0x1] sm:$0x1] %vm603_vm10, %v602_v27   ;;  %vm710_vm10 = vcmask 220352  }
 0x122   :  { %v595_v26 = vpop.permute.xlu0 %594  }
 0x123   :  { %598 = vst.msk [vmem:[#allocation0 + $0x2] sm:$0x1] %vm596_vm9, %v595_v26   ;;  %vm703_vm9 = vcmask 228552  }
 0x124   :  { %v615_v29 = vpop.permute.xlu1 %614  }
 0x125   :  { %618 = vst.msk [vmem:[#allocation0 + $0x2] sm:$0x1] %vm616_vm12, %v615_v29   ;;  %vm723_vm12 = vcmask 203952  }
 0x126   :  { %v609_v28 = vpop.permute.xlu0 %608  }
 0x127   :  { %611 = vst.msk [vmem:[#allocation0] sm:$0x1] %vm610_vm11, %v609_v28   ;;  %vm716_vm11 = vcmask 212152  }
 0x128   :  { %v629_v31 = vpop.permute.xlu1 %628  }
 0x129   :  { %631 = vst.msk [vmem:[#allocation0] sm:$0x1] %vm630_vm14, %v629_v31   ;;  %vm736_vm14 = vcmask 187552  }
 0x12a   :  { %v622_v30 = vpop.permute.xlu0 %621  }
 0x12b   :  { %625 = vst.msk [vmem:[#allocation0 + $0x1] sm:$0x1] %vm623_vm13, %v622_v30   ;;  %vm730_vm13 = vcmask 195752  }
 0x12c   :  { %v642_v33 = vpop.permute.xlu1 %641  }
 0x12d   :  { %645 = vst.msk [vmem:[#allocation0 + $0x1] sm:$0x1] %vm643_vm0, %v642_v33   ;;  %vm750_vm0 = vcmask 171152  }
 0x12e   :  { %v635_v32 = vpop.permute.xlu0 %634  }
 0x12f   :  { %638 = vst.msk [vmem:[#allocation0 + $0x2] sm:$0x1] %vm636_vm15, %v635_v32   ;;  %vm743_vm15 = vcmask 179352  }
 0x130   :  { %v655_v35 = vpop.permute.xlu1 %654  }
 0x131   :  { %658 = vst.msk [vmem:[#allocation0 + $0x2] sm:$0x1] %vm656_vm2, %v655_v35   ;;  %vm763_vm2 = vcmask 154752  }
 0x132   :  { %v649_v34 = vpop.permute.xlu0 %648  }
 0x133   :  { %651 = vst.msk [vmem:[#allocation0] sm:$0x1] %vm650_vm1, %v649_v34   ;;  %vm756_vm1 = vcmask 162952  }
 0x134   :  { %v669_v37 = vpop.permute.xlu1 %668  }
 0x135   :  { %671 = vst.msk [vmem:[#allocation0] sm:$0x1] %vm670_vm4, %v669_v37   ;;  %vm776_vm4 = vcmask 138352  }
 0x136   :  { %v662_v36 = vpop.permute.xlu0 %661  }
 0x137   :  { %665 = vst.msk [vmem:[#allocation0 + $0x1] sm:$0x1] %vm663_vm3, %v662_v36   ;;  %vm770_vm3 = vcmask 146552  }
 0x138   :  { %v682_v39 = vpop.permute.xlu1 %681  }
 0x139   :  { %685 = vst.msk [vmem:[#allocation0 + $0x1] sm:$0x1] %vm683_vm6, %v682_v39   ;;  %vm790_vm6 = vcmask 121952  }
 0x13a   :  { %v675_v38 = vpop.permute.xlu0 %674  }
 0x13b   :  { %678 = vst.msk [vmem:[#allocation0 + $0x2] sm:$0x1] %vm676_vm5, %v675_v38   ;;  %vm783_vm5 = vcmask 130152  }
 0x13c   :  { %v695_v41 = vpop.permute.xlu1 %694  }
 0x13d   :  { %698 = vst.msk [vmem:[#allocation0 + $0x2] sm:$0x1] %vm696_vm8, %v695_v41   ;;  %vm803_vm8 = vcmask 105552  }
 0x13e   :  { %v689_v40 = vpop.permute.xlu0 %688  }
 0x13f   :  { %691 = vst.msk [vmem:[#allocation0] sm:$0x1] %vm690_vm7, %v689_v40   ;;  %vm796_vm7 = vcmask 113752  }
 0x140   :  { %v709_v43 = vpop.permute.xlu1 %708  }
 0x141   :  { %711 = vst.msk [vmem:[#allocation0] sm:$0x1] %vm710_vm10, %v709_v43   ;;  %vm816_vm10 = vcmask 89152  }
 0x142   :  { %v702_v42 = vpop.permute.xlu0 %701  }
 0x143   :  { %705 = vst.msk [vmem:[#allocation0 + $0x1] sm:$0x1] %vm703_vm9, %v702_v42   ;;  %vm810_vm9 = vcmask 97352  }
 0x144   :  { %v722_v45 = vpop.permute.xlu1 %721  }
 0x145   :  { %725 = vst.msk [vmem:[#allocation0 + $0x1] sm:$0x1] %vm723_vm12, %v722_v45   ;;  %vm830_vm12 = vcmask 72752  }
 0x146   :  { %v715_v44 = vpop.permute.xlu0 %714  }
 0x147   :  { %718 = vst.msk [vmem:[#allocation0 + $0x2] sm:$0x1] %vm716_vm11, %v715_v44   ;;  %vm823_vm11 = vcmask 80952  }
 0x148   :  { %v735_v47 = vpop.permute.xlu1 %734  }
 0x149   :  { %738 = vst.msk [vmem:[#allocation0 + $0x2] sm:$0x1] %vm736_vm14, %v735_v47   ;;  %vm843_vm14 = vcmask 56352  }
 0x14a   :  { %v729_v46 = vpop.permute.xlu0 %728  }
 0x14b   :  { %731 = vst.msk [vmem:[#allocation0] sm:$0x1] %vm730_vm13, %v729_v46   ;;  %vm836_vm13 = vcmask 64552  }
 0x14c   :  { %v749_v49 = vpop.permute.xlu1 %748  }
 0x14d   :  { %751 = vst.msk [vmem:[#allocation0] sm:$0x1] %vm750_vm0, %v749_v49   ;;  %vm856_vm0 = vcmask 39952  }
 0x14e   :  { %v742_v48 = vpop.permute.xlu0 %741  }
 0x14f   :  { %745 = vst.msk [vmem:[#allocation0 + $0x1] sm:$0x1] %vm743_vm15, %v742_v48   ;;  %vm850_vm15 = vcmask 48152  }
 0x150   :  { %v762_v51 = vpop.permute.xlu1 %761  }
 0x151   :  { %765 = vst.msk [vmem:[#allocation0 + $0x1] sm:$0x1] %vm763_vm2, %v762_v51  }
 0x152   :  { %v755_v50 = vpop.permute.xlu0 %754  }
 0x153   :  { %758 = vst.msk [vmem:[#allocation0 + $0x2] sm:$0x1] %vm756_vm1, %v755_v50   ;;  %vm863_vm1 = vcmask 31752  }
 0x154   :  { %v775_v53 = vpop.permute.xlu1 %774  }
 0x155   :  { %778 = vst.msk [vmem:[#allocation0 + $0x2] sm:$0x1] %vm776_vm4, %v775_v53  }
 0x156   :  { %v769_v52 = vpop.permute.xlu0 %768  }
 0x157   :  { %771 = vst.msk [vmem:[#allocation0] sm:$0x1] %vm770_vm3, %v769_v52  }
 0x158   :  { %v789_v55 = vpop.permute.xlu1 %788  }
 0x159   :  { %791 = vst.msk [vmem:[#allocation0] sm:$0x1] %vm790_vm6, %v789_v55  }
 0x15a   :  { %v782_v54 = vpop.permute.xlu0 %781  }
 0x15b   :  { %785 = vst.msk [vmem:[#allocation0 + $0x1] sm:$0x1] %vm783_vm5, %v782_v54  }
 0x15c   :  { %v802_v57 = vpop.permute.xlu1 %801  }
 0x15d   :  { %805 = vst.msk [vmem:[#allocation0 + $0x1] sm:$0x1] %vm803_vm8, %v802_v57  }
 0x15e   :  { %v795_v56 = vpop.permute.xlu0 %794  }
 0x15f   :  { %798 = vst.msk [vmem:[#allocation0 + $0x2] sm:$0x1] %vm796_vm7, %v795_v56  }
 0x160   :  { %v815_v59 = vpop.permute.xlu1 %814  }
 0x161   :  { %818 = vst.msk [vmem:[#allocation0 + $0x2] sm:$0x1] %vm816_vm10, %v815_v59  }
 0x162   :  { %v809_v58 = vpop.permute.xlu0 %808  }
 0x163   :  { %811 = vst.msk [vmem:[#allocation0] sm:$0x1] %vm810_vm9, %v809_v58  }
 0x164   :  { %v829_v61 = vpop.permute.xlu1 %828  }
 0x165   :  { %831 = vst.msk [vmem:[#allocation0] sm:$0x1] %vm830_vm12, %v829_v61  }
 0x166   :  { %v822_v60 = vpop.permute.xlu0 %821  }
 0x167   :  { %825 = vst.msk [vmem:[#allocation0 + $0x1] sm:$0x1] %vm823_vm11, %v822_v60  }
 0x168   :  { %v842_v63 = vpop.permute.xlu1 %841  }
 0x169   :  { %845 = vst.msk [vmem:[#allocation0 + $0x1] sm:$0x1] %vm843_vm14, %v842_v63  }
 0x16a   :  { %v835_v62 = vpop.permute.xlu0 %834  }
 0x16b   :  { %838 = vst.msk [vmem:[#allocation0 + $0x2] sm:$0x1] %vm836_vm13, %v835_v62  }
 0x16c   :  { %v855_v1 = vpop.permute.xlu1 %854  }
 0x16d   :  { %858 = vst.msk [vmem:[#allocation0 + $0x2] sm:$0x1] %vm856_vm0, %v855_v1  }
 0x16e   :  { %v849_v0 = vpop.permute.xlu0 %848  }
 0x16f   :  { %851 = vst.msk [vmem:[#allocation0] sm:$0x1] %vm850_vm15, %v849_v0  }
 0x172   :  { %v862_v2 = vpop.permute.xlu0 %861  }
 0x173   :  { %865 = vst.msk [vmem:[#allocation0 + $0x1] sm:$0x1] %vm863_vm1, %v862_v2  }
 0x17a   :  { %v869_v3 = vld [vmem:[#allocation0] sm:$0xf] }
 0x17b   :  { %871 = vst [vmem:[%s1663_s1] sm:$0xf] %v869_v3 }

// kernel: compute_loss.1
= control target key start
LH: loop header
LB: loop body
LE: loop exit
PB: predicated region body
PF: predicated region fallthrough
CT: control target
= control target key end

     0   :  { %9 = vsyncpa [#allocation4], 0  ;;  %s230_s0 = inlined_call_operand.vmem [shape: f32[4], index: 0, kind: input, shape index: {}]   ;;  %s231_s1 = inlined_call_operand.vmem [shape: f32[80,128], index: 1, kind: input, shape index: {}]   ;;  %s232_s2 = inlined_call_operand.vmem [shape: f32[8,128], index: 2, kind: input, shape index: {}]   ;;  %s233_s3 = inlined_call_operand.vmem [shape: f32[8,128], index: 3, kind: input, shape index: {}]   ;;  %s234_s4 = inlined_call_operand.vmem [shape: f32[8,128], index: 4, kind: output, shape index: {}]  }
   0x1   :  { %s16_s17 = sshll.u32 %s230_s0, 4  ;;  %s17_s17 = int_to_ptr.vmem [resolvable:$true] %s16_s17 }
   0x2   :  { %s148_s18 = scalar_lea.vmem %s17_s17, 16  ;;  %p153_p1 = scmp.lt.s32.totalorder %s17_s17, %s17_s17 }
   0x3   :  { %p149_p0 = scmp.ne.s32.totalorder %s17_s17, %s148_s18  ;;  %p154_p2 = scmp.lt.s32.totalorder %s148_s18, %s148_s18 }
   0x5   :  { %p155_p3 = por %p154_p2, %p153_p1 }
   0x7   :  { %p156_p4 = pnand %p155_p3, %p149_p0 }
   0x9   :  { %159 = shalt.err (!%p156_p4)
}
   0xa   :  { %s162_s19 = smov [#allocation3]  }
   0xb   :  { %19 = dma.vmem_to_smem %s17_s17, 16, %s162_s19, [#allocation4]  }
   0xc   :  { %160 = dma.done.wait [#allocation4], 16  }
   0xd   :  { %161 = vsyncadd [#allocation4], 4294967280 }
   0xe   :  { %29 = sfence }
   0xf   :  { %v30_v0 = vld [vmem:[%s232_s2] sm:$0xff]  ;;  %s48_s0 = sld [smem:[#allocation3]]  ;;  %s134_s24 = sld [smem:[#allocation3 + $0x3]]  ;;  %v54_v4 = vld [vmem:[%s231_s1 + $0x10] sm:$0xff]  ;;  %v53_v12 = vld [vmem:[%s231_s1 + $0x8] sm:$0xff] }
  0x10   :  { %v31_v1 = vld [vmem:[%s233_s3] sm:$0xff]  ;;  %s132_s27 = sld [smem:[#allocation3 + $0x1]]  ;;  %s133_s2 = sld [smem:[#allocation3 + $0x2]]  ;;  %v55_v23 = vld [vmem:[%s231_s1 + $0x18] sm:$0xff]  ;;  %v58_v34 = vld [vmem:[%s231_s1 + $0x30] sm:$0xff] }
  0x11   :  { %v32_v2 = vsub.f32 %v30_v0, %v31_v1  ;;  %v52_v11 = vld [vmem:[%s231_s1] sm:$0xff]  ;;  %v93_v35 = vmul.f32 %v58_v34, %v58_v34  ;;  %v59_v37 = vld [vmem:[%s231_s1 + $0x38] sm:$0xff]  ;;  %v61_v38 = vld [vmem:[%s231_s1 + $0x48] sm:$0xff] }
  0x12   :  { %v60_v17 = vld [vmem:[%s231_s1 + $0x40] sm:$0xff]  ;;  %v57_v47 = vld [vmem:[%s231_s1 + $0x28] sm:$0xff] }
  0x13   :  { %v33_v3 = vmul.f32 %v32_v2, %v32_v2  ;;  %v95_v21 = vmul.f32 2.0, %v60_v17  ;;  %v56_v24 = vld [vmem:[%s231_s1 + $0x20] sm:$0xff]  ;;  %v94_v42 = vmul.f32 %v93_v35, %v59_v37 }
  0x15   :  { %34 = vadd.xlane.f32.xlu0 %v33_v3  ;;  %v62_v5 = vstv %s48_s0  ;;  %v70_v7 = vstv %s134_s24  ;;  %v96_v27 = vmul.f32 1.442695, %v95_v21 }
  0x16   :  { %v69_v6 = vmul.f32 %v62_v5, %v54_v4  ;;  %v63_v13 = vmul.f32 %v62_v5, %v52_v11  ;;  %v66_v14 = vmul.f32 %v62_v5, %v53_v12  ;;  %v64_v15 = vstv %s132_s27 }
  0x17   :  { %v67_v16 = vstv %s133_s2 }
  0x18   :  { %v71_v8 = vadd.f32 %v70_v7, %v69_v6  ;;  %v65_v18 = vadd.f32 %v64_v15, %v63_v13  ;;  %v68_v19 = vadd.f32 %v67_v16, %v66_v14 }
  0x1a   :  { %v72_v9 = vand.u32 2147483647, %v71_v8 }
  0x1c   :  { %vm73_vm0 = vcmp.lt.f32.partialorder %v72_v9, 1e-08 }
  0x1d   :  { %v74_v10 = vsel %vm73_vm0, 1e-08, %v71_v8 }
  0x1e   :  { %140 = vrcp.f32 %v74_v10 }
  0x1f   :  { %142 = vpow2.f32 %v96_v27 }
  0x28   :  { %v141_v20 = vpop.eup %140 }
  0x29   :  { %v76_v22 = vmul.f32 500.0, %v141_v20  ;;  %v143_v36 = vpop.eup %142 }
  0x2a   :  { %v98_v43 = vmul.f32 %v143_v36, %v61_v38 }
  0x2b   :  { %v77_v25 = vmul.f32 %v76_v22, %v65_v18  ;;  %v79_v26 = vmul.f32 %v76_v22, %v68_v19 }
  0x2c   :  { %v99_v49 = vadd.f32 %v98_v43, %v94_v42 }
  0x2d   :  { %v78_v28 = vsub.f32 %v55_v23, %v77_v25  ;;  %v80_v29 = vsub.f32 %v56_v24, %v79_v26 }
  0x2f   :  { %v81_v30 = vmul.f32 %v78_v28, %v78_v28  ;;  %v82_v31 = vmul.f32 %v80_v29, %v80_v29 }
  0x31   :  { %v84_v32 = vadd.f32 10000.0, %v81_v30  ;;  %v88_v33 = vadd.f32 10000.0, %v82_v31  ;;  %v83_v39 = vmul.f32 10000.0, %v81_v30  ;;  %v87_v40 = vmul.f32 10000.0, %v82_v31 }
  0x33   :  { %144 = vrcp.f32 %v84_v32 }
  0x34   :  { %146 = vrcp.f32 %v88_v33 }
  0x3d   :  { %v145_v41 = vpop.eup %144 }
  0x3e   :  { %v147_v44 = vpop.eup %146  ;;  %v86_v45 = vmul.f32 %v145_v41, %v83_v39 }
  0x3f   :  { %v90_v46 = vmul.f32 %v147_v44, %v87_v40 }
  0x41   :  { %v91_v48 = vadd.f32 %v90_v46, %v86_v45 }
  0x43   :  { %v92_v50 = vmul.f32 %v91_v48, %v57_v47 }
  0x45   :  { %v100_v51 = vadd.f32 %v99_v49, %v92_v50 }
  0x47   :  { %101 = vadd.xlane.f32.xlu0 %v100_v51 }
  0xa2   :  { %v35_v52 = vpop.xlane.xlu0 %34 }
  0xa3   :  { %v36_v53 = vrot.slane %v35_v52, 4 }
  0xa5   :  { %v37_v54 = vadd.f32 %v36_v53, %v35_v52 }
  0xa7   :  { %v38_v55 = vrot.slane %v37_v54, 2 }
  0xa9   :  { %v39_v56 = vadd.f32 %v38_v55, %v37_v54 }
  0xab   :  { %v40_v57 = vrot.slane %v39_v56, 1 }
  0xad   :  { %v41_v58 = vadd.f32 %v40_v57, %v39_v56 }
  0xaf   :  { %135 = vpush %v41_v58 }
  0xd4   :  { %v102_v59 = vpop.xlane.xlu0 %101 }
  0xd5   :  { %v103_v60 = vrot.slane %v102_v59, 4 }
  0xd7   :  { %v104_v61 = vadd.f32 %v103_v60, %v102_v59 }
  0xd9   :  { %v105_v62 = vrot.slane %v104_v61, 2 }
  0xdb   :  { %v106_v63 = vadd.f32 %v105_v62, %v104_v61 }
  0xdd   :  { %v107_v0 = vrot.slane %v106_v63, 1 }
  0xdf   :  { %v108_v1 = vadd.f32 %v107_v0, %v106_v63 }
  0xe0   :  { %s136_s1 = spop %135 }
  0xe1   :  { %137 = vpush %v108_v1  ;;  %s43_s19 = smul.f32 0.0026041667, %s136_s1 }
 0x112   :  { %s138_s20 = spop %137 }
 0x113   :  { %s110_s21 = sadd.f32 %s138_s20, %s43_s19 }
 0x115   :  { %v125_v2 = vstv %s110_s21 }
 0x116   :  { %126 = vst [vmem:[%s234_s4] sm:$0xff] %v125_v2 }
 0x117   :  { %131 = vsyncpa [#allocation4], 1 }

</bundles_post_ra>
